<compile_context>
chip_gen: v7x
topology: tpu7x:2x2x1
jax: 0.10.0
libtpu: 0.0.40
codegen_flags: <defaults>
</compile_context>

<pallas_src>
from functools import partial

import jax
import jax.numpy as jnp
from jax import lax
from jax.experimental import pallas as pl
from jax.experimental.pallas import tpu as pltpu


# ============================================================================ Pallas kernels

def _input_conv_kernel(xp_ref, w_ref, b_ref, o_ref, *, T):
    """InputLayer Conv1d('same') + ReLU for one branch, whole batch per grid step.

    xp: (B, T+ks-1, K) padded input (shared by both branches); w: (1, ks, K, K) bf16 taps
    (already transposed to (Cin, Cout)); b: (1, 1, K).  The 7 taps are accumulated as
    (B*T, K)x(K, K) matmuls so no im2col array is ever materialized in HBM.
    """
    xp = xp_ref[...]                                        # (B, Tp, K) f32
    B = xp.shape[0]
    K = xp.shape[2]
    ks = w_ref.shape[1]
    acc = jnp.zeros((B * T, K), jnp.float32)
    for k in range(ks):                                     # static tap unroll
        xs = xp[:, k:k + T, :].reshape(B * T, K)
        acc = acc + jnp.dot(xs.astype(jnp.bfloat16), w_ref[0, k],
                            preferred_element_type=jnp.float32)
    y = jnp.maximum(acc + b_ref[0], 0.0)                    # bias + ReLU
    o_ref[0] = y.reshape(B, T, K)


def pallas_input_layers(xp, w, b, *, T):
    """Both InputLayers (ks=5 / ks=7 unified to 7 centred taps); grid over branches only."""
    B, Tp, K = xp.shape
    ks = w.shape[1]
    return pl.pallas_call(
        partial(_input_conv_kernel, T=T),
        grid=(2,),
        in_specs=[pl.BlockSpec((B, Tp, K), lambda i: (0, 0, 0)),
                  pl.BlockSpec((1, ks, K, K), lambda i: (i, 0, 0, 0)),
                  pl.BlockSpec((1, 1, K), lambda i: (i, 0, 0))],
        out_specs=pl.BlockSpec((1, B, T, K), lambda i: (i, 0, 0, 0)),
        out_shape=jax.ShapeDtypeStruct((2, B, T, K), jnp.float32),
        compiler_params=pltpu.CompilerParams(dimension_semantics=("parallel",)),
    )(xp, w, b)


def _stgat_block_kernel(hT_ref, gatwt_ref, csrc_ref, adst_ref, gatb_ref,
                        maskb_ref, gcnw_ref, gcnb_ref, anormt_ref, o_ref):
    """One residual StgatBlock for one branch over the whole batch (transposed (K,T) domain).

    hT: (B, K, T).  GAT over the K feature-nodes (T-dim node features) followed by a temporal
    GCN over the T time-nodes, then the residual add.  Shared weights are broadcast so every
    contraction is a plain batched MXU matmul (no in-kernel transposes of activations).
    """
    hT = hT_ref[0]                                          # (B, K, T) f32
    B, K, T = hT.shape

    # ---- GAT over feature nodes -----------------------------------------------------------
    gat_w_b = jnp.broadcast_to(gatwt_ref[0], (B, T, T))     # bf16
    wh = jnp.einsum('bkt,bts->bks', hT.astype(jnp.bfloat16), gat_w_b,
                    preferred_element_type=jnp.float32)     # (B, K, T)  = W x_j
    d = jnp.sum(wh * adst_ref[0], axis=2, keepdims=True)    # (B, K, 1)  alpha_dst per target
    s = jnp.sum(hT * csrc_ref[0], axis=2)                   # (B, K)     alpha_src per source
    e = d + s[:, None, :]                                   # e[b,i,j] = d_i + s_j
    e = jnp.where(e >= 0.0, e, 0.2 * e)                     # LeakyReLU(0.2)
    e = e + maskb_ref[...]                                  # additive mask bias (0 / -1e30)
    e = e - jnp.max(e, axis=2, keepdims=True)
    p = jnp.exp(e)
    alpha = p / jnp.sum(p, axis=2, keepdims=True)           # exact softmax
    f_out = jnp.einsum('bij,bjt->bit', alpha.astype(jnp.bfloat16),
                       wh.astype(jnp.bfloat16),
                       preferred_element_type=jnp.float32) + gatb_ref[0]
    f_out = jnp.maximum(f_out, 0.0)                         # (B, K, T), ReLU fused

    # ---- GCN over time nodes (transposed domain): t_out^T = gcn_w @ f_out @ anorm^T + b ----
    gcn_w_b = jnp.broadcast_to(gcnw_ref[0], (B, K, K))
    xw = jnp.einsum('bkj,bjt->bkt', gcn_w_b, f_out.astype(jnp.bfloat16),
                    preferred_element_type=jnp.float32)     # (B, K, T)
    anorm_b = jnp.broadcast_to(anormt_ref[...], (B, T, T))
    t_out = jnp.einsum('bkt,bts->bks', xw.astype(jnp.bfloat16), anorm_b,
                       preferred_element_type=jnp.float32) + gcnb_ref[0]
    o_ref[0] = hT + jnp.maximum(t_out, 0.0)                 # residual, stays in (B, K, T)


def pallas_stgat_block(hT, blk, mask_bias, anorm_t):
    """All 3 branches of one StgatBlock layer; grid = 3 (whole batch per step)."""
    N3, B, K, T = hT.shape
    return pl.pallas_call(
        _stgat_block_kernel,
        grid=(N3,),
        in_specs=[pl.BlockSpec((1, B, K, T), lambda i: (i, 0, 0, 0)),
                  pl.BlockSpec((1, T, T), lambda i: (i, 0, 0)),
                  pl.BlockSpec((1, 1, T), lambda i: (i, 0, 0)),
                  pl.BlockSpec((1, 1, T), lambda i: (i, 0, 0)),
                  pl.BlockSpec((1, 1, T), lambda i: (i, 0, 0)),
                  pl.BlockSpec((K, K), lambda i: (0, 0)),
                  pl.BlockSpec((1, K, K), lambda i: (i, 0, 0)),
                  pl.BlockSpec((1, K, 1), lambda i: (i, 0, 0)),
                  pl.BlockSpec((T, T), lambda i: (0, 0))],
        out_specs=pl.BlockSpec((1, B, K, T), lambda i: (i, 0, 0, 0)),
        out_shape=jax.ShapeDtypeStruct((N3, B, K, T), jnp.float32),
        compiler_params=pltpu.CompilerParams(dimension_semantics=("parallel",)),
    )(hT, blk['gat_w_t'], blk['csrc'], blk['adst'], blk['gat_b'],
      mask_bias, blk['gcn_w'], blk['gcn_b'], anorm_t)


def _bilstm_kernel(xt_ref, wih_ref, whh_ref, b_ref, o_ref, *, T, H):
    """Whole BiLSTM in one grid step: fw recurrence as an in-kernel fori_loop (h/c in vregs),
    bw direction needs only its first step because only out[:, -1, :] is consumed downstream.
    Writes only the consumed hiddens, once, as a dense (B, 2H) block."""
    B = xt_ref.shape[1]

    def lstm_step(x, h, c, d):
        g = (jnp.dot(x.astype(jnp.bfloat16), wih_ref[d],
                     preferred_element_type=jnp.float32)
             + jnp.dot(h.astype(jnp.bfloat16), whh_ref[d],
                       preferred_element_type=jnp.float32)
             + b_ref[d])                                    # (B, 4H)
        i = jax.nn.sigmoid(g[:, 0:H])
        f = jax.nn.sigmoid(g[:, H:2 * H])
        gg = jnp.tanh(g[:, 2 * H:3 * H])
        o = jax.nn.sigmoid(g[:, 3 * H:4 * H])
        c_new = f * c + i * gg
        h_new = o * jnp.tanh(c_new)
        return h_new, c_new

    h0 = jnp.zeros((B, H), jnp.float32)
    c0 = jnp.zeros((B, H), jnp.float32)

    def fw_body(t, carry):
        h, c = carry
        return lstm_step(xt_ref[t], h, c, 0)

    h_fw, _ = lax.fori_loop(0, T, fw_body, (h0, c0))        # forward hidden at t = T-1
    h_bw, _ = lstm_step(xt_ref[T - 1], h0, c0, 1)           # backward hidden at t = T-1

    o_ref[:, 0:H] = h_fw
    o_ref[:, H:2 * H] = h_bw


def pallas_bilstm(xt, p):
    """Bidirectional LSTM; xt: (T, B, D) -> h_end (B, 2H) (only consumed outputs produced)."""
    T, B, D = xt.shape
    H4 = p['wih_t'].shape[2]
    H = H4 // 4
    return pl.pallas_call(
        partial(_bilstm_kernel, T=T, H=H),
        grid=(1,),
        in_specs=[pl.BlockSpec((T, B, D), lambda i: (0, 0, 0)),
                  pl.BlockSpec((2, D, H4), lambda i: (0, 0, 0)),
                  pl.BlockSpec((2, H, H4), lambda i: (0, 0, 0)),
                  pl.BlockSpec((2, 1, H4), lambda i: (0, 0, 0))],
        out_specs=pl.BlockSpec((B, 2 * H), lambda i: (0, 0)),
        out_shape=jax.ShapeDtypeStruct((B, 2 * H), jnp.float32),
        compiler_params=pltpu.CompilerParams(dimension_semantics=("arbitrary",)),
    )(xt, p['wih_t'], p['whh_t'], p['bias'])


def _gru_fc_kernel(xt_ref, wih_ref, whh_ref, bih_ref, bhh_ref, fcw_ref, fcb_ref,
                   out_ref, *, T, H):
    """GRU decoder + reconstruction FC, whole recurrence in one grid step (fori_loop)."""
    B = xt_ref.shape[1]
    h0 = jnp.zeros((B, H), jnp.float32)

    def body(t, h):
        x = xt_ref[t]                                        # (B, D2)
        gx = jnp.dot(x.astype(jnp.bfloat16), wih_ref[...],
                     preferred_element_type=jnp.float32) + bih_ref[...]
        gh = jnp.dot(h.astype(jnp.bfloat16), whh_ref[...],
                     preferred_element_type=jnp.float32) + bhh_ref[...]
        r = jax.nn.sigmoid(gx[:, 0:H] + gh[:, 0:H])
        z = jax.nn.sigmoid(gx[:, H:2 * H] + gh[:, H:2 * H])
        n = jnp.tanh(gx[:, 2 * H:3 * H] + r * gh[:, 2 * H:3 * H])
        h_new = (1.0 - z) * n + z * h
        out_ref[t] = jnp.dot(h_new.astype(jnp.bfloat16), fcw_ref[...],
                             preferred_element_type=jnp.float32) + fcb_ref[...]
        return h_new

    lax.fori_loop(0, T, body, h0)


def pallas_gru_decoder(xt, p):
    """GRU decoder + FC fused.  xt: (T, B, D2) -> (T, B, out_dim)."""
    T, B, D2 = xt.shape
    H3 = p['wih_t'].shape[1]
    H = H3 // 3
    out_dim = p['fc_w_t'].shape[1]
    return pl.pallas_call(
        partial(_gru_fc_kernel, T=T, H=H),
        grid=(1,),
        in_specs=[pl.BlockSpec((T, B, D2), lambda i: (0, 0, 0)),
                  pl.BlockSpec((D2, H3), lambda i: (0, 0)),
                  pl.BlockSpec((H, H3), lambda i: (0, 0)),
                  pl.BlockSpec((1, H3), lambda i: (0, 0)),
                  pl.BlockSpec((1, H3), lambda i: (0, 0)),
                  pl.BlockSpec((H, out_dim), lambda i: (0, 0)),
                  pl.BlockSpec((1, out_dim), lambda i: (0, 0))],
        out_specs=pl.BlockSpec((T, B, out_dim), lambda i: (0, 0, 0)),
        out_shape=jax.ShapeDtypeStruct((T, B, out_dim), jnp.float32),
        compiler_params=pltpu.CompilerParams(dimension_semantics=("arbitrary",)),
    )(xt, p['wih_t'], p['whh_t'], p['bih'], p['bhh'], p['fc_w_t'], p['fc_b'])


def _mlp_kernel(*refs, nlayers):
    # refs = (x, w0, b0, ..., w_{n-1}, b_{n-1}, out); intermediates stay in VMEM/vregs.
    x = refs[0][...]
    o_ref = refs[-1]
    for l in range(nlayers):
        w = refs[1 + 2 * l][...]
        b = refs[2 + 2 * l][...]
        x = jnp.dot(x.astype(jnp.bfloat16), w, preferred_element_type=jnp.float32) + b
        if l < nlayers - 1:
            x = jnp.maximum(x, 0.0)     # ReLU; dropout (eval) = identity
    o_ref[...] = x


def pallas_mlp(x, p):
    """Whole Forecasting_Model MLP fused into one kernel."""
    B, Din = x.shape
    ws, bs = p['ws_t'], p['bs']
    nlayers = len(ws)
    in_specs = [pl.BlockSpec((B, Din), lambda i: (0, 0))]
    args = [x]
    for w, b in zip(ws, bs):
        in_specs.append(pl.BlockSpec(w.shape, lambda i: (0, 0)))
        in_specs.append(pl.BlockSpec(b.shape, lambda i: (0, 0)))
        args.extend([w, b])
    out_dim = ws[-1].shape[1]
    return pl.pallas_call(
        partial(_mlp_kernel, nlayers=nlayers),
        grid=(1,),
        in_specs=in_specs,
        out_specs=pl.BlockSpec((B, out_dim), lambda i: (0, 0)),
        out_shape=jax.ShapeDtypeStruct((B, out_dim), jnp.float32),
        compiler_params=pltpu.CompilerParams(dimension_semantics=("arbitrary",)),
    )(*args)


# ============================================================================ graph helpers

def build_gat_mask(edge_index, num_nodes):
    """Dense per-sample mask: mask[i, j] = 1 iff edge j->i (plus self loops, GATConv default)."""
    src, dst = edge_index[0], edge_index[1]
    m = jnp.zeros((num_nodes, num_nodes), jnp.float32)
    m = m.at[dst, src].set(1.0)
    idx = jnp.arange(num_nodes)
    return m.at[idx, idx].set(1.0)


def build_gcn_norm(edge_index, num_nodes):
    """Dense per-sample  D^{-1/2}(A+I)D^{-1/2}  (PyG gcn_norm semantics)."""
    src, dst = edge_index[0], edge_index[1]
    a = jnp.zeros((num_nodes, num_nodes), jnp.float32)
    a = a.at[dst, src].set(1.0)
    idx = jnp.arange(num_nodes)
    a = a.at[idx, idx].set(1.0)
    deg = jnp.sum(a, axis=1)
    dis = 1.0 / jnp.sqrt(jnp.maximum(deg, 1e-12))
    return a * dis[:, None] * dis[None, :]


# ============================================================================ one-time prepare

def prepare_params(params, fc_edge_index, tc_edge_index, n_features, window):
    """Hoist all weight transposes / casts / graph-matrix construction out of the forward pass."""
    K, T = n_features, window
    prep = {}

    gat_mask = build_gat_mask(fc_edge_index[-1], K)                               # (K, K)
    prep['gat_mask_bias'] = jnp.where(gat_mask > 0.0, jnp.float32(0.0),
                                      jnp.float32(-1e30))                         # additive bias
    prep['gcn_anorm_t'] = jnp.transpose(
        build_gcn_norm(tc_edge_index[-1], T)).astype(jnp.bfloat16)                # (T, T)

    def conv_taps(w, ks_max):
        # torch Conv1d weight (Cout, Cin, ks) -> (ks_max, Cin, Cout), centred zero-padded taps
        Cout, Cin, ks = w.shape
        taps = jnp.transpose(w, (2, 1, 0)).astype(jnp.float32)                    # (ks, Cin, Cout)
        padd = (ks_max - ks) // 2
        return jnp.pad(taps, ((padd, padd), (0, 0), (0, 0)))

    ks_max = params['input_3']['w'].shape[2]                                      # 7
    prep['conv_w'] = jnp.stack([conv_taps(params['input_2']['w'], ks_max),
                                conv_taps(params['input_3']['w'], ks_max)]).astype(jnp.bfloat16)
    prep['conv_b'] = jnp.stack([params['input_2']['b'],
                                params['input_3']['b']]).reshape(2, 1, K).astype(jnp.float32)

    blocks = []
    for l in range(len(params['stgat_1'])):
        ps = [params[name][l] for name in ('stgat_1', 'stgat_2', 'stgat_3')]
        blocks.append({
            'gat_w_t': jnp.stack([jnp.transpose(p['gat_w']) for p in ps]).astype(jnp.bfloat16),
            # csrc = gat_w^T @ att_src  (so that s_j = sum_t hT[j, t] * csrc[t])
            'csrc': jnp.stack([jnp.dot(p['gat_att_src'], p['gat_w']).reshape(1, T)
                               for p in ps]).astype(jnp.float32),
            'adst': jnp.stack([p['gat_att_dst'].reshape(1, T) for p in ps]).astype(jnp.float32),
            'gat_b': jnp.stack([p['gat_b'].reshape(1, T) for p in ps]).astype(jnp.float32),
            'gcn_w': jnp.stack([p['gcn_w'] for p in ps]).astype(jnp.bfloat16),
            'gcn_b': jnp.stack([p['gcn_b'].reshape(K, 1) for p in ps]).astype(jnp.float32),
        })
    prep['blocks'] = blocks

    bl = params['bilstm']
    prep['bilstm'] = {
        'wih_t': jnp.stack([jnp.transpose(bl['fw']['wih']),
                            jnp.transpose(bl['bw']['wih'])]).astype(jnp.bfloat16),   # (2, D, 4H)
        'whh_t': jnp.stack([jnp.transpose(bl['fw']['whh']),
                            jnp.transpose(bl['bw']['whh'])]).astype(jnp.bfloat16),   # (2, H, 4H)
        'bias': jnp.stack([(bl['fw']['bih'] + bl['fw']['bhh']).reshape(1, -1),
                           (bl['bw']['bih'] + bl['bw']['bhh']).reshape(1, -1)]).astype(jnp.float32),
    }

    rc = params['recon']
    prep['recon'] = {
        'wih_t': jnp.transpose(rc['gru']['wih']).astype(jnp.bfloat16),
        'whh_t': jnp.transpose(rc['gru']['whh']).astype(jnp.bfloat16),
        'bih': rc['gru']['bih'].reshape(1, -1).astype(jnp.float32),
        'bhh': rc['gru']['bhh'].reshape(1, -1).astype(jnp.float32),
        'fc_w_t': jnp.transpose(rc['fc_w']).astype(jnp.bfloat16),
        'fc_b': rc['fc_b'].reshape(1, -1).astype(jnp.float32),
    }

    prep['forest'] = {
        'ws_t': [jnp.transpose(w).astype(jnp.bfloat16) for w in params['forest']['ws']],
        'bs': [b.reshape(1, -1).astype(jnp.float32) for b in params['forest']['bs']],
    }
    return prep


# ============================================================================ forward pass

def stgat_forward(prep, x):
    B, T, K = x.shape
    x = x.astype(jnp.float32)

    # ---- InputLayers 2 & 3 (ks=5 / ks=7 unified to 7 taps); taps accumulated in-kernel
    ks = prep['conv_w'].shape[1]
    pad = (ks - 1) // 2
    xp = jnp.pad(x, ((0, 0), (pad, pad), (0, 0)))                    # (B, T+6, K), read once
    conv_out = pallas_input_layers(xp, prep['conv_w'], prep['conv_b'], T=T)   # (2, B, T, K)

    # ---- 3 parallel STGAT branches; hT (3, B, K, T) is the only layout carried through layers
    hT = jnp.concatenate([jnp.transpose(x, (0, 2, 1))[None],
                          jnp.transpose(conv_out, (0, 1, 3, 2))], axis=0)     # (3, B, K, T)
    for blk in prep['blocks']:
        hT = pallas_stgat_block(hT, blk, prep['gat_mask_bias'], prep['gcn_anorm_t'])

    # ---- BiLSTM: xt[t, b, br*K + k] = hT[br, b, k, t]  (== torch.cat([h1,h2,h3], dim=2))
    xt = jnp.transpose(hT, (3, 1, 0, 2)).reshape(T, B, 3 * K)        # (T, B, 3K)
    h_end = pallas_bilstm(xt, prep['bilstm'])                        # (B, 2H) = out[:, -1, :]

    # ---- Reconstruction: GRU decoder + FC fused
    D2 = h_end.shape[1]
    # torch repeat_interleave(window, dim=1).view(B, T, D2) semantics (feature interleave)
    h_rep = jnp.repeat(h_end, T, axis=1).reshape(B, T, D2)
    rec_t = pallas_gru_decoder(jnp.transpose(h_rep, (1, 0, 2)), prep['recon'])   # (T, B, out)
    recons = jnp.transpose(rec_t, (1, 0, 2))                         # (B, T, out)

    # ---- Forecasting MLP (fully fused)
    forest = pallas_mlp(h_end, prep['forest'])                       # (B, out)
    return recons, forest


# ============================================================================ params / inputs

def init_params(key, K, T, out_dim, H, Hr, layer_numb):
    keys = iter(jax.random.split(key, 256))

    def w(shape, scale=0.1):
        return jax.random.normal(next(keys), shape, dtype=jnp.float32) * scale

    params = {
        'input_2': {'w': w((K, K, 5)), 'b': w((K,))},
        'input_3': {'w': w((K, K, 7)), 'b': w((K,))},
    }

    def block():
        return {'gat_w': w((T, T)), 'gat_att_src': w((T,)), 'gat_att_dst': w((T,)),
                'gat_b': w((T,)), 'gcn_w': w((K, K)), 'gcn_b': w((K,))}

    for name in ('stgat_1', 'stgat_2', 'stgat_3'):
        params[name] = [block() for _ in range(layer_numb)]

    D = 3 * K

    def lstm_dir():
        return {'wih': w((4 * H, D)), 'whh': w((4 * H, H)),
                'bih': w((4 * H,)), 'bhh': w((4 * H,))}

    params['bilstm'] = {'fw': lstm_dir(), 'bw': lstm_dir()}
    params['recon'] = {'gru': {'wih': w((3 * Hr, 2 * H)), 'whh': w((3 * Hr, Hr)),
                               'bih': w((3 * Hr,)), 'bhh': w((3 * Hr,))},
                       'fc_w': w((out_dim, Hr)), 'fc_b': w((out_dim,))}
    # Forecasting_Model with n_layers = recon_n_layers*3 = 3 -> 4 linears total
    params['forest'] = {'ws': [w((Hr, 2 * H)), w((Hr, Hr)), w((Hr, Hr)), w((out_dim, Hr))],
                        'bs': [w((Hr,)), w((Hr,)), w((Hr,)), w((out_dim,))]}
    return params


def fully_connected_edges(n):
    pairs = [(i, j) for i in range(n) for j in range(n) if i != j]
    return jnp.asarray(pairs, dtype=jnp.int32).T[None]               # (1, 2, E)


# ============================================================================ main

if __name__ == "__main__":
    B, T, K = 2, 8, 4            # batch, window_size, n_features
    out_dim = K
    H, Hr = 16, 16               # lstm_hid_dim, recon_hid_dim (small test sizes)
    layer_numb = 2

    key = jax.random.PRNGKey(0)
    kx, kp = jax.random.split(key)
    x = jax.random.normal(kx, (B, T, K), dtype=jnp.float32)
    fc_edge_index = fully_connected_edges(K)                         # (1, 2, K*(K-1))
    tc_edge_index = fully_connected_edges(T)                         # (1, 2, T*(T-1))

    params = init_params(kp, K, T, out_dim, H, Hr, layer_numb)
    # one-time preparation: weight transposes/casts, stacked branch params, dense graphs
    prep = prepare_params(params, fc_edge_index, tc_edge_index, K, T)

    fwd = jax.jit(stgat_forward)
    recons, forest = fwd(prep, x)
    jax.block_until_ready((recons, forest))

    assert recons.shape == (B, T, out_dim), recons.shape
    assert forest.shape == (B, out_dim), forest.shape
    assert bool(jnp.all(jnp.isfinite(recons))) and bool(jnp.all(jnp.isfinite(forest)))
    print("KERNEL_OK")
</pallas_src>

<mosaic_0001>
module attributes {stable_mosaic.version = 11 : i64} {
  func.func @_input_conv_kernel(%arg0: i32, %arg1: memref<2x14x4xf32, #tpu.memory_space<vmem>>, %arg2: memref<1x7x4x4xbf16, #tpu.memory_space<vmem>>, %arg3: memref<1x1x4xf32, #tpu.memory_space<vmem>>, %arg4: memref<1x2x8x4xf32, #tpu.memory_space<vmem>>) attributes {dimension_semantics = [#tpu.dimension_semantics<parallel>], iteration_bounds = array<i64: 2>, scalar_prefetch = 0 : i64, scratch_operands = 0 : i64, tpu.core_type = #tpu.core_type<tc>, window_params = [{pipeline_mode = #tpu.pipeline_mode<synchronous>, transform_indices = @transform_0, window_bounds = array<i64: 2, 14, 4>}, {transform_indices = @transform_1, window_bounds = array<i64: 1, 7, 4, 4>}, {transform_indices = @transform_2, window_bounds = array<i64: 1, 1, 4>}, {transform_indices = @transform_3, window_bounds = array<i64: 1, 2, 8, 4>}]} {
    %c0 = arith.constant 0 : index
    %c0_0 = arith.constant 0 : index
    %c0_1 = arith.constant 0 : index
    %0 = vector.load %arg1[%c0, %c0_0, %c0_1] : memref<2x14x4xf32, #tpu.memory_space<vmem>>, vector<2x14x4xf32>
    %cst = arith.constant 0.000000e+00 : f32
    %1 = vector.broadcast %cst : f32 to vector<16x4xf32>
    %2 = vector.extract_strided_slice %0 {offsets = [0, 0, 0], sizes = [2, 8, 4], strides = [1, 1, 1]} : vector<2x14x4xf32> to vector<2x8x4xf32>
    %3 = vector.shape_cast %2 : vector<2x8x4xf32> to vector<16x4xf32>
    %4 = arith.truncf %3 : vector<16x4xf32> to vector<16x4xbf16>
    %c0_2 = arith.constant 0 : index
    %c0_3 = arith.constant 0 : index
    %c0_4 = arith.constant 0 : index
    %c0_5 = arith.constant 0 : index
    %5 = vector.load %arg2[%c0_2, %c0_3, %c0_4, %c0_5] : memref<1x7x4x4xbf16, #tpu.memory_space<vmem>>, vector<1x1x4x4xbf16>
    %6 = vector.shape_cast %5 : vector<1x1x4x4xbf16> to vector<4x4xbf16>
    %cst_6 = arith.constant dense<0.000000e+00> : vector<16x4xf32>
    %7 = tpu.matmul %4, %6, %cst_6 {dimension_numbers = #tpu.dot_dimension_numbers<[1], [0], [0], [1], [0, 0, 1, 1], [], []>} : vector<16x4xbf16>, vector<4x4xbf16>, vector<16x4xf32> -> vector<16x4xf32>
    %8 = arith.addf %1, %7 : vector<16x4xf32>
    %9 = vector.extract_strided_slice %0 {offsets = [0, 1, 0], sizes = [2, 8, 4], strides = [1, 1, 1]} : vector<2x14x4xf32> to vector<2x8x4xf32>
    %10 = vector.shape_cast %9 : vector<2x8x4xf32> to vector<16x4xf32>
    %11 = arith.truncf %10 : vector<16x4xf32> to vector<16x4xbf16>
    %c0_7 = arith.constant 0 : index
    %c1 = arith.constant 1 : index
    %c0_8 = arith.constant 0 : index
    %c0_9 = arith.constant 0 : index
    %12 = vector.load %arg2[%c0_7, %c1, %c0_8, %c0_9] : memref<1x7x4x4xbf16, #tpu.memory_space<vmem>>, vector<1x1x4x4xbf16>
    %13 = vector.shape_cast %12 : vector<1x1x4x4xbf16> to vector<4x4xbf16>
    %cst_10 = arith.constant dense<0.000000e+00> : vector<16x4xf32>
    %14 = tpu.matmul %11, %13, %cst_10 {dimension_numbers = #tpu.dot_dimension_numbers<[1], [0], [0], [1], [0, 0, 1, 1], [], []>} : vector<16x4xbf16>, vector<4x4xbf16>, vector<16x4xf32> -> vector<16x4xf32>
    %15 = arith.addf %8, %14 : vector<16x4xf32>
    %16 = vector.extract_strided_slice %0 {offsets = [0, 2, 0], sizes = [2, 8, 4], strides = [1, 1, 1]} : vector<2x14x4xf32> to vector<2x8x4xf32>
    %17 = vector.shape_cast %16 : vector<2x8x4xf32> to vector<16x4xf32>
    %18 = arith.truncf %17 : vector<16x4xf32> to vector<16x4xbf16>
    %c0_11 = arith.constant 0 : index
    %c2 = arith.constant 2 : index
    %c0_12 = arith.constant 0 : index
    %c0_13 = arith.constant 0 : index
    %19 = vector.load %arg2[%c0_11, %c2, %c0_12, %c0_13] : memref<1x7x4x4xbf16, #tpu.memory_space<vmem>>, vector<1x1x4x4xbf16>
    %20 = vector.shape_cast %19 : vector<1x1x4x4xbf16> to vector<4x4xbf16>
    %cst_14 = arith.constant dense<0.000000e+00> : vector<16x4xf32>
    %21 = tpu.matmul %18, %20, %cst_14 {dimension_numbers = #tpu.dot_dimension_numbers<[1], [0], [0], [1], [0, 0, 1, 1], [], []>} : vector<16x4xbf16>, vector<4x4xbf16>, vector<16x4xf32> -> vector<16x4xf32>
    %22 = arith.addf %15, %21 : vector<16x4xf32>
    %23 = vector.extract_strided_slice %0 {offsets = [0, 3, 0], sizes = [2, 8, 4], strides = [1, 1, 1]} : vector<2x14x4xf32> to vector<2x8x4xf32>
    %24 = vector.shape_cast %23 : vector<2x8x4xf32> to vector<16x4xf32>
    %25 = arith.truncf %24 : vector<16x4xf32> to vector<16x4xbf16>
    %c0_15 = arith.constant 0 : index
    %c3 = arith.constant 3 : index
    %c0_16 = arith.constant 0 : index
    %c0_17 = arith.constant 0 : index
    %26 = vector.load %arg2[%c0_15, %c3, %c0_16, %c0_17] : memref<1x7x4x4xbf16, #tpu.memory_space<vmem>>, vector<1x1x4x4xbf16>
    %27 = vector.shape_cast %26 : vector<1x1x4x4xbf16> to vector<4x4xbf16>
    %cst_18 = arith.constant dense<0.000000e+00> : vector<16x4xf32>
    %28 = tpu.matmul %25, %27, %cst_18 {dimension_numbers = #tpu.dot_dimension_numbers<[1], [0], [0], [1], [0, 0, 1, 1], [], []>} : vector<16x4xbf16>, vector<4x4xbf16>, vector<16x4xf32> -> vector<16x4xf32>
    %29 = arith.addf %22, %28 : vector<16x4xf32>
    %30 = vector.extract_strided_slice %0 {offsets = [0, 4, 0], sizes = [2, 8, 4], strides = [1, 1, 1]} : vector<2x14x4xf32> to vector<2x8x4xf32>
    %31 = vector.shape_cast %30 : vector<2x8x4xf32> to vector<16x4xf32>
    %32 = arith.truncf %31 : vector<16x4xf32> to vector<16x4xbf16>
    %c0_19 = arith.constant 0 : index
    %c4 = arith.constant 4 : index
    %c0_20 = arith.constant 0 : index
    %c0_21 = arith.constant 0 : index
    %33 = vector.load %arg2[%c0_19, %c4, %c0_20, %c0_21] : memref<1x7x4x4xbf16, #tpu.memory_space<vmem>>, vector<1x1x4x4xbf16>
    %34 = vector.shape_cast %33 : vector<1x1x4x4xbf16> to vector<4x4xbf16>
    %cst_22 = arith.constant dense<0.000000e+00> : vector<16x4xf32>
    %35 = tpu.matmul %32, %34, %cst_22 {dimension_numbers = #tpu.dot_dimension_numbers<[1], [0], [0], [1], [0, 0, 1, 1], [], []>} : vector<16x4xbf16>, vector<4x4xbf16>, vector<16x4xf32> -> vector<16x4xf32>
    %36 = arith.addf %29, %35 : vector<16x4xf32>
    %37 = vector.extract_strided_slice %0 {offsets = [0, 5, 0], sizes = [2, 8, 4], strides = [1, 1, 1]} : vector<2x14x4xf32> to vector<2x8x4xf32>
    %38 = vector.shape_cast %37 : vector<2x8x4xf32> to vector<16x4xf32>
    %39 = arith.truncf %38 : vector<16x4xf32> to vector<16x4xbf16>
    %c0_23 = arith.constant 0 : index
    %c5 = arith.constant 5 : index
    %c0_24 = arith.constant 0 : index
    %c0_25 = arith.constant 0 : index
    %40 = vector.load %arg2[%c0_23, %c5, %c0_24, %c0_25] : memref<1x7x4x4xbf16, #tpu.memory_space<vmem>>, vector<1x1x4x4xbf16>
    %41 = vector.shape_cast %40 : vector<1x1x4x4xbf16> to vector<4x4xbf16>
    %cst_26 = arith.constant dense<0.000000e+00> : vector<16x4xf32>
    %42 = tpu.matmul %39, %41, %cst_26 {dimension_numbers = #tpu.dot_dimension_numbers<[1], [0], [0], [1], [0, 0, 1, 1], [], []>} : vector<16x4xbf16>, vector<4x4xbf16>, vector<16x4xf32> -> vector<16x4xf32>
    %43 = arith.addf %36, %42 : vector<16x4xf32>
    %44 = vector.extract_strided_slice %0 {offsets = [0, 6, 0], sizes = [2, 8, 4], strides = [1, 1, 1]} : vector<2x14x4xf32> to vector<2x8x4xf32>
    %45 = vector.shape_cast %44 : vector<2x8x4xf32> to vector<16x4xf32>
    %46 = arith.truncf %45 : vector<16x4xf32> to vector<16x4xbf16>
    %c0_27 = arith.constant 0 : index
    %c6 = arith.constant 6 : index
    %c0_28 = arith.constant 0 : index
    %c0_29 = arith.constant 0 : index
    %47 = vector.load %arg2[%c0_27, %c6, %c0_28, %c0_29] : memref<1x7x4x4xbf16, #tpu.memory_space<vmem>>, vector<1x1x4x4xbf16>
    %48 = vector.shape_cast %47 : vector<1x1x4x4xbf16> to vector<4x4xbf16>
    %cst_30 = arith.constant dense<0.000000e+00> : vector<16x4xf32>
    %49 = tpu.matmul %46, %48, %cst_30 {dimension_numbers = #tpu.dot_dimension_numbers<[1], [0], [0], [1], [0, 0, 1, 1], [], []>} : vector<16x4xbf16>, vector<4x4xbf16>, vector<16x4xf32> -> vector<16x4xf32>
    %50 = arith.addf %43, %49 : vector<16x4xf32>
    %c0_31 = arith.constant 0 : index
    %c0_32 = arith.constant 0 : index
    %c0_33 = arith.constant 0 : index
    %51 = vector.load %arg3[%c0_31, %c0_32, %c0_33] : memref<1x1x4xf32, #tpu.memory_space<vmem>>, vector<1x1x4xf32>
    %52 = vector.shape_cast %51 : vector<1x1x4xf32> to vector<1x4xf32>
    %53 = vector.broadcast %52 : vector<1x4xf32> to vector<16x4xf32>
    %54 = arith.addf %50, %53 : vector<16x4xf32>
    %cst_34 = arith.constant 0.000000e+00 : f32
    %55 = vector.broadcast %cst_34 : f32 to vector<16x4xf32>
    %56 = arith.maximumf %54, %55 : vector<16x4xf32>
    %57 = vector.shape_cast %56 : vector<16x4xf32> to vector<2x8x4xf32>
    %c0_35 = arith.constant 0 : index
    %c0_36 = arith.constant 0 : index
    %c0_37 = arith.constant 0 : index
    %c0_38 = arith.constant 0 : index
    %58 = vector.load %arg4[%c0_35, %c0_36, %c0_37, %c0_38] : memref<1x2x8x4xf32, #tpu.memory_space<vmem>>, vector<1x2x8x4xf32>
    %59 = vector.shape_cast %58 : vector<1x2x8x4xf32> to vector<2x8x4xf32>
    %60 = vector.shape_cast %57 : vector<2x8x4xf32> to vector<1x2x8x4xf32>
    tpu.vector_store %arg4[%c0_35, %c0_36, %c0_37, %c0_38], %60 {strides = array<i32>} : memref<1x2x8x4xf32, #tpu.memory_space<vmem>>, vector<1x2x8x4xf32>,
    return
  }
  func.func @transform_0(%arg0: i32) -> (i32, i32, i32) {
    %c0_i32 = arith.constant 0 : i32
    %c0_i32_0 = arith.constant 0 : i32
    %c0_i32_1 = arith.constant 0 : i32
    %c0_i32_2 = arith.constant 0 : i32
    return %c0_i32, %c0_i32_0, %c0_i32_1 : i32, i32, i32
  }
  func.func @transform_1(%arg0: i32) -> (i32, i32, i32, i32) {
    %c0_i32 = arith.constant 0 : i32
    %c0_i32_0 = arith.constant 0 : i32
    %c0_i32_1 = arith.constant 0 : i32
    %c0_i32_2 = arith.constant 0 : i32
    return %arg0, %c0_i32, %c0_i32_0, %c0_i32_1 : i32, i32, i32, i32
  }
  func.func @transform_2(%arg0: i32) -> (i32, i32, i32) {
    %c0_i32 = arith.constant 0 : i32
    %c0_i32_0 = arith.constant 0 : i32
    %c0_i32_1 = arith.constant 0 : i32
    return %arg0, %c0_i32, %c0_i32_0 : i32, i32, i32
  }
  func.func @transform_3(%arg0: i32) -> (i32, i32, i32, i32) {
    %c0_i32 = arith.constant 0 : i32
    %c0_i32_0 = arith.constant 0 : i32
    %c0_i32_1 = arith.constant 0 : i32
    %c0_i32_2 = arith.constant 0 : i32
    return %arg0, %c0_i32, %c0_i32_0, %c0_i32_1 : i32, i32, i32, i32
  }
}

module attributes {stable_mosaic.version = 11 : i64} {
  func.func @_stgat_block_kernel(%arg0: i32, %arg1: memref<1x2x4x8xf32, #tpu.memory_space<vmem>>, %arg2: memref<1x8x8xbf16, #tpu.memory_space<vmem>>, %arg3: memref<1x1x8xf32, #tpu.memory_space<vmem>>, %arg4: memref<1x1x8xf32, #tpu.memory_space<vmem>>, %arg5: memref<1x1x8xf32, #tpu.memory_space<vmem>>, %arg6: memref<4x4xf32, #tpu.memory_space<vmem>>, %arg7: memref<1x4x4xbf16, #tpu.memory_space<vmem>>, %arg8: memref<1x4x1xf32, #tpu.memory_space<vmem>>, %arg9: memref<8x8xbf16, #tpu.memory_space<vmem>>, %arg10: memref<1x2x4x8xf32, #tpu.memory_space<vmem>>) attributes {dimension_semantics = [#tpu.dimension_semantics<parallel>], iteration_bounds = array<i64: 3>, scalar_prefetch = 0 : i64, scratch_operands = 0 : i64, tpu.core_type = #tpu.core_type<tc>, window_params = [{transform_indices = @transform_0, window_bounds = array<i64: 1, 2, 4, 8>}, {transform_indices = @transform_1, window_bounds = array<i64: 1, 8, 8>}, {transform_indices = @transform_2, window_bounds = array<i64: 1, 1, 8>}, {transform_indices = @transform_3, window_bounds = array<i64: 1, 1, 8>}, {transform_indices = @transform_4, window_bounds = array<i64: 1, 1, 8>}, {pipeline_mode = #tpu.pipeline_mode<synchronous>, transform_indices = @transform_5, window_bounds = array<i64: 4, 4>}, {transform_indices = @transform_6, window_bounds = array<i64: 1, 4, 4>}, {transform_indices = @transform_7, window_bounds = array<i64: 1, 4, 1>}, {pipeline_mode = #tpu.pipeline_mode<synchronous>, transform_indices = @transform_8, window_bounds = array<i64: 8, 8>}, {transform_indices = @transform_9, window_bounds = array<i64: 1, 2, 4, 8>}]} {
    %c0 = arith.constant 0 : index
    %c0_0 = arith.constant 0 : index
    %c0_1 = arith.constant 0 : index
    %c0_2 = arith.constant 0 : index
    %0 = vector.load %arg1[%c0, %c0_0, %c0_1, %c0_2] : memref<1x2x4x8xf32, #tpu.memory_space<vmem>>, vector<1x2x4x8xf32>
    %1 = vector.shape_cast %0 : vector<1x2x4x8xf32> to vector<2x4x8xf32>
    %c0_3 = arith.constant 0 : index
    %c0_4 = arith.constant 0 : index
    %c0_5 = arith.constant 0 : index
    %2 = vector.load %arg2[%c0_3, %c0_4, %c0_5] : memref<1x8x8xbf16, #tpu.memory_space<vmem>>, vector<1x8x8xbf16>
    %3 = vector.shape_cast %2 : vector<1x8x8xbf16> to vector<8x8xbf16>
    %4 = vector.shape_cast %3 : vector<8x8xbf16> to vector<1x8x8xbf16>
    %5 = vector.broadcast %4 : vector<1x8x8xbf16> to vector<2x8x8xbf16>
    %6 = arith.truncf %1 : vector<2x4x8xf32> to vector<2x4x8xbf16>
    "tpu.trace_start"() <{level = 10 : i32, message = "bkt,bts->bks"}> : () -> ()
    %cst = arith.constant dense<0.000000e+00> : vector<2x4x8xf32>
    %7 = tpu.matmul %6, %5, %cst {dimension_numbers = #tpu.dot_dimension_numbers<[2], [1], [1], [2], [0, 0, 0, 1, 1, 2], [0], [0]>} : vector<2x4x8xbf16>, vector<2x8x8xbf16>, vector<2x4x8xf32> -> vector<2x4x8xf32>
    "tpu.trace_stop"() : () -> ()
    %c0_6 = arith.constant 0 : index
    %c0_7 = arith.constant 0 : index
    %c0_8 = arith.constant 0 : index
    %8 = vector.load %arg4[%c0_6, %c0_7, %c0_8] : memref<1x1x8xf32, #tpu.memory_space<vmem>>, vector<1x1x8xf32>
    %9 = vector.shape_cast %8 : vector<1x1x8xf32> to vector<1x8xf32>
    %10 = vector.shape_cast %9 : vector<1x8xf32> to vector<1x1x8xf32>
    %11 = vector.broadcast %10 : vector<1x1x8xf32> to vector<2x4x8xf32>
    %12 = arith.mulf %7, %11 : vector<2x4x8xf32>
    %cst_9 = arith.constant dense<0.000000e+00> : vector<2x4xf32>
    %13 = vector.multi_reduction <add>, %12, %cst_9 [2] : vector<2x4x8xf32> to vector<2x4xf32>
    %14 = vector.shape_cast %13 : vector<2x4xf32> to vector<2x4x1xf32>
    %c0_10 = arith.constant 0 : index
    %c0_11 = arith.constant 0 : index
    %c0_12 = arith.constant 0 : index
    %15 = vector.load %arg3[%c0_10, %c0_11, %c0_12] : memref<1x1x8xf32, #tpu.memory_space<vmem>>, vector<1x1x8xf32>
    %16 = vector.shape_cast %15 : vector<1x1x8xf32> to vector<1x8xf32>
    %17 = vector.shape_cast %16 : vector<1x8xf32> to vector<1x1x8xf32>
    %18 = vector.broadcast %17 : vector<1x1x8xf32> to vector<2x4x8xf32>
    %19 = arith.mulf %1, %18 : vector<2x4x8xf32>
    %cst_13 = arith.constant dense<0.000000e+00> : vector<2x4xf32>
    %20 = vector.multi_reduction <add>, %19, %cst_13 [2] : vector<2x4x8xf32> to vector<2x4xf32>
    %21 = vector.shape_cast %20 : vector<2x4xf32> to vector<2x1x4xf32>
    %22 = vector.broadcast %14 : vector<2x4x1xf32> to vector<2x4x4xf32>
    %23 = vector.broadcast %21 : vector<2x1x4xf32> to vector<2x4x4xf32>
    %24 = arith.addf %22, %23 : vector<2x4x4xf32>
    %cst_14 = arith.constant 0.000000e+00 : f32
    %25 = vector.broadcast %cst_14 : f32 to vector<2x4x4xf32>
    %26 = arith.cmpf oge, %24, %25 : vector<2x4x4xf32>
    %cst_15 = arith.constant 2.000000e-01 : f32
    %27 = vector.broadcast %cst_15 : f32 to vector<2x4x4xf32>
    %28 = arith.mulf %27, %24 : vector<2x4x4xf32>
    %29 = arith.select %26, %24, %28 : vector<2x4x4xi1>, vector<2x4x4xf32>
    %c0_16 = arith.constant 0 : index
    %c0_17 = arith.constant 0 : index
    %30 = vector.load %arg6[%c0_16, %c0_17] : memref<4x4xf32, #tpu.memory_space<vmem>>, vector<4x4xf32>
    %31 = vector.shape_cast %30 : vector<4x4xf32> to vector<1x4x4xf32>
    %32 = vector.broadcast %31 : vector<1x4x4xf32> to vector<2x4x4xf32>
    %33 = arith.addf %29, %32 : vector<2x4x4xf32>
    %cst_18 = arith.constant dense<0xFF800000> : vector<2x4xf32>
    %34 = vector.multi_reduction <maximumf>, %33, %cst_18 [2] : vector<2x4x4xf32> to vector<2x4xf32>
    %35 = vector.shape_cast %34 : vector<2x4xf32> to vector<2x4x1xf32>
    %36 = vector.broadcast %35 : vector<2x4x1xf32> to vector<2x4x4xf32>
    %37 = arith.subf %33, %36 : vector<2x4x4xf32>
    %38 = math.exp %37 : vector<2x4x4xf32>
    %cst_19 = arith.constant dense<0.000000e+00> : vector<2x4xf32>
    %39 = vector.multi_reduction <add>, %38, %cst_19 [2] : vector<2x4x4xf32> to vector<2x4xf32>
    %40 = vector.shape_cast %39 : vector<2x4xf32> to vector<2x4x1xf32>
    %41 = vector.broadcast %40 : vector<2x4x1xf32> to vector<2x4x4xf32>
    %42 = arith.divf %38, %41 : vector<2x4x4xf32>
    %43 = arith.truncf %42 : vector<2x4x4xf32> to vector<2x4x4xbf16>
    %44 = arith.truncf %7 : vector<2x4x8xf32> to vector<2x4x8xbf16>
    "tpu.trace_start"() <{level = 10 : i32, message = "bij,bjt->bit"}> : () -> ()
    %cst_20 = arith.constant dense<0.000000e+00> : vector<2x4x8xf32>
    %45 = tpu.matmul %43, %44, %cst_20 {dimension_numbers = #tpu.dot_dimension_numbers<[2], [1], [1], [2], [0, 0, 0, 1, 1, 2], [0], [0]>} : vector<2x4x4xbf16>, vector<2x4x8xbf16>, vector<2x4x8xf32> -> vector<2x4x8xf32>
    "tpu.trace_stop"() : () -> ()
    %c0_21 = arith.constant 0 : index
    %c0_22 = arith.constant 0 : index
    %c0_23 = arith.constant 0 : index
    %46 = vector.load %arg5[%c0_21, %c0_22, %c0_23] : memref<1x1x8xf32, #tpu.memory_space<vmem>>, vector<1x1x8xf32>
    %47 = vector.shape_cast %46 : vector<1x1x8xf32> to vector<1x8xf32>
    %48 = vector.shape_cast %47 : vector<1x8xf32> to vector<1x1x8xf32>
    %49 = vector.broadcast %48 : vector<1x1x8xf32> to vector<2x4x8xf32>
    %50 = arith.addf %45, %49 : vector<2x4x8xf32>
    %cst_24 = arith.constant 0.000000e+00 : f32
    %51 = vector.broadcast %cst_24 : f32 to vector<2x4x8xf32>
    %52 = arith.maximumf %50, %51 : vector<2x4x8xf32>
    %c0_25 = arith.constant 0 : index
    %c0_26 = arith.constant 0 : index
    %c0_27 = arith.constant 0 : index
    %53 = vector.load %arg7[%c0_25, %c0_26, %c0_27] : memref<1x4x4xbf16, #tpu.memory_space<vmem>>, vector<1x4x4xbf16>
    %54 = vector.shape_cast %53 : vector<1x4x4xbf16> to vector<4x4xbf16>
    %55 = vector.shape_cast %54 : vector<4x4xbf16> to vector<1x4x4xbf16>
    %56 = vector.broadcast %55 : vector<1x4x4xbf16> to vector<2x4x4xbf16>
    %57 = arith.truncf %52 : vector<2x4x8xf32> to vector<2x4x8xbf16>
    "tpu.trace_start"() <{level = 10 : i32, message = "bkj,bjt->bkt"}> : () -> ()
    %cst_28 = arith.constant dense<0.000000e+00> : vector<2x4x8xf32>
    %58 = tpu.matmul %56, %57, %cst_28 {dimension_numbers = #tpu.dot_dimension_numbers<[2], [1], [1], [2], [0, 0, 0, 1, 1, 2], [0], [0]>} : vector<2x4x4xbf16>, vector<2x4x8xbf16>, vector<2x4x8xf32> -> vector<2x4x8xf32>
    "tpu.trace_stop"() : () -> ()
    %c0_29 = arith.constant 0 : index
    %c0_30 = arith.constant 0 : index
    %59 = vector.load %arg9[%c0_29, %c0_30] : memref<8x8xbf16, #tpu.memory_space<vmem>>, vector<8x8xbf16>
    %60 = vector.shape_cast %59 : vector<8x8xbf16> to vector<1x8x8xbf16>
    %61 = vector.broadcast %60 : vector<1x8x8xbf16> to vector<2x8x8xbf16>
    %62 = arith.truncf %58 : vector<2x4x8xf32> to vector<2x4x8xbf16>
    "tpu.trace_start"() <{level = 10 : i32, message = "bkt,bts->bks"}> : () -> ()
    %cst_31 = arith.constant dense<0.000000e+00> : vector<2x4x8xf32>
    %63 = tpu.matmul %62, %61, %cst_31 {dimension_numbers = #tpu.dot_dimension_numbers<[2], [1], [1], [2], [0, 0, 0, 1, 1, 2], [0], [0]>} : vector<2x4x8xbf16>, vector<2x8x8xbf16>, vector<2x4x8xf32> -> vector<2x4x8xf32>
    "tpu.trace_stop"() : () -> ()
    %c0_32 = arith.constant 0 : index
    %c0_33 = arith.constant 0 : index
    %c0_34 = arith.constant 0 : index
    %64 = vector.load %arg8[%c0_32, %c0_33, %c0_34] : memref<1x4x1xf32, #tpu.memory_space<vmem>>, vector<1x4x1xf32>
    %65 = vector.shape_cast %64 : vector<1x4x1xf32> to vector<4x1xf32>
    %66 = vector.shape_cast %65 : vector<4x1xf32> to vector<1x4x1xf32>
    %67 = vector.broadcast %66 : vector<1x4x1xf32> to vector<2x4x8xf32>
    %68 = arith.addf %63, %67 : vector<2x4x8xf32>
    %cst_35 = arith.constant 0.000000e+00 : f32
    %69 = vector.broadcast %cst_35 : f32 to vector<2x4x8xf32>
    %70 = arith.maximumf %68, %69 : vector<2x4x8xf32>
    %71 = arith.addf %1, %70 : vector<2x4x8xf32>
    %c0_36 = arith.constant 0 : index
    %c0_37 = arith.constant 0 : index
    %c0_38 = arith.constant 0 : index
    %c0_39 = arith.constant 0 : index
    %72 = vector.load %arg10[%c0_36, %c0_37, %c0_38, %c0_39] : memref<1x2x4x8xf32, #tpu.memory_space<vmem>>, vector<1x2x4x8xf32>
    %73 = vector.shape_cast %72 : vector<1x2x4x8xf32> to vector<2x4x8xf32>
    %74 = vector.shape_cast %71 : vector<2x4x8xf32> to vector<1x2x4x8xf32>
    tpu.vector_store %arg10[%c0_36, %c0_37, %c0_38, %c0_39], %74 {strides = array<i32>} : memref<1x2x4x8xf32, #tpu.memory_space<vmem>>, vector<1x2x4x8xf32>,
    return
  }
  func.func @transform_0(%arg0: i32) -> (i32, i32, i32, i32) {
    %c0_i32 = arith.constant 0 : i32
    %c0_i32_0 = arith.constant 0 : i32
    %c0_i32_1 = arith.constant 0 : i32
    %c0_i32_2 = arith.constant 0 : i32
    return %arg0, %c0_i32, %c0_i32_0, %c0_i32_1 : i32, i32, i32, i32
  }
  func.func @transform_1(%arg0: i32) -> (i32, i32, i32) {
    %c0_i32 = arith.constant 0 : i32
    %c0_i32_0 = arith.constant 0 : i32
    %c0_i32_1 = arith.constant 0 : i32
    return %arg0, %c0_i32, %c0_i32_0 : i32, i32, i32
  }
  func.func @transform_2(%arg0: i32) -> (i32, i32, i32) {
    %c0_i32 = arith.constant 0 : i32
    %c0_i32_0 = arith.constant 0 : i32
    %c0_i32_1 = arith.constant 0 : i32
    return %arg0, %c0_i32, %c0_i32_0 : i32, i32, i32
  }
  func.func @transform_3(%arg0: i32) -> (i32, i32, i32) {
    %c0_i32 = arith.constant 0 : i32
    %c0_i32_0 = arith.constant 0 : i32
    %c0_i32_1 = arith.constant 0 : i32
    return %arg0, %c0_i32, %c0_i32_0 : i32, i32, i32
  }
  func.func @transform_4(%arg0: i32) -> (i32, i32, i32) {
    %c0_i32 = arith.constant 0 : i32
    %c0_i32_0 = arith.constant 0 : i32
    %c0_i32_1 = arith.constant 0 : i32
    return %arg0, %c0_i32, %c0_i32_0 : i32, i32, i32
  }
  func.func @transform_5(%arg0: i32) -> (i32, i32) {
    %c0_i32 = arith.constant 0 : i32
    %c0_i32_0 = arith.constant 0 : i32
    %c0_i32_1 = arith.constant 0 : i32
    return %c0_i32, %c0_i32_0 : i32, i32
  }
  func.func @transform_6(%arg0: i32) -> (i32, i32, i32) {
    %c0_i32 = arith.constant 0 : i32
    %c0_i32_0 = arith.constant 0 : i32
    %c0_i32_1 = arith.constant 0 : i32
    return %arg0, %c0_i32, %c0_i32_0 : i32, i32, i32
  }
  func.func @transform_7(%arg0: i32) -> (i32, i32, i32) {
    %c0_i32 = arith.constant 0 : i32
    %c0_i32_0 = arith.constant 0 : i32
    %c0_i32_1 = arith.constant 0 : i32
    return %arg0, %c0_i32, %c0_i32_0 : i32, i32, i32
  }
  func.func @transform_8(%arg0: i32) -> (i32, i32) {
    %c0_i32 = arith.constant 0 : i32
    %c0_i32_0 = arith.constant 0 : i32
    %c0_i32_1 = arith.constant 0 : i32
    return %c0_i32, %c0_i32_0 : i32, i32
  }
  func.func @transform_9(%arg0: i32) -> (i32, i32, i32, i32) {
    %c0_i32 = arith.constant 0 : i32
    %c0_i32_0 = arith.constant 0 : i32
    %c0_i32_1 = arith.constant 0 : i32
    %c0_i32_2 = arith.constant 0 : i32
    return %arg0, %c0_i32, %c0_i32_0, %c0_i32_1 : i32, i32, i32, i32
  }
}

module attributes {stable_mosaic.version = 11 : i64} {
  func.func @_bilstm_kernel(%arg0: i32, %arg1: memref<8x2x12xf32, #tpu.memory_space<vmem>>, %arg2: memref<2x12x64xbf16, #tpu.memory_space<vmem>>, %arg3: memref<2x16x64xbf16, #tpu.memory_space<vmem>>, %arg4: memref<2x1x64xf32, #tpu.memory_space<vmem>>, %arg5: memref<2x32xf32, #tpu.memory_space<vmem>>) attributes {dimension_semantics = [#tpu.dimension_semantics<arbitrary>], iteration_bounds = array<i64: 1>, scalar_prefetch = 0 : i64, scratch_operands = 0 : i64, tpu.core_type = #tpu.core_type<tc>, window_params = [{pipeline_mode = #tpu.pipeline_mode<synchronous>, transform_indices = @transform_0, window_bounds = array<i64: 8, 2, 12>}, {pipeline_mode = #tpu.pipeline_mode<synchronous>, transform_indices = @transform_1, window_bounds = array<i64: 2, 12, 64>}, {pipeline_mode = #tpu.pipeline_mode<synchronous>, transform_indices = @transform_2, window_bounds = array<i64: 2, 16, 64>}, {pipeline_mode = #tpu.pipeline_mode<synchronous>, transform_indices = @transform_3, window_bounds = array<i64: 2, 1, 64>}, {pipeline_mode = #tpu.pipeline_mode<synchronous>, transform_indices = @transform_4, window_bounds = array<i64: 2, 32>}]} {
    %cst = arith.constant 0.000000e+00 : f32
    %0 = vector.broadcast %cst : f32 to vector<2x16xf32>
    %cst_0 = arith.constant 0.000000e+00 : f32
    %1 = vector.broadcast %cst_0 : f32 to vector<2x16xf32>
    %c0_i32 = arith.constant 0 : i32
    %c8_i32 = arith.constant 8 : i32
    %2 = arith.addi %c0_i32, %c8_i32 : i32
    %c1_i32 = arith.constant 1 : i32
    %3:2 = scf.for %arg6 = %c0_i32 to %2 step %c1_i32 iter_args(%arg7 = %0, %arg8 = %1) -> (vector<2x16xf32>, vector<2x16xf32>)  : i32 {
      %46 = arith.index_cast %arg6 : i32 to index
      %c0_19 = arith.constant 0 : index
      %c0_20 = arith.constant 0 : index
      %47 = vector.load %arg1[%46, %c0_19, %c0_20] : memref<8x2x12xf32, #tpu.memory_space<vmem>>, vector<1x2x12xf32>
      %48 = vector.shape_cast %47 : vector<1x2x12xf32> to vector<2x12xf32>
      %49 = arith.truncf %48 : vector<2x12xf32> to vector<2x12xbf16>
      %c0_21 = arith.constant 0 : index
      %c0_22 = arith.constant 0 : index
      %c0_23 = arith.constant 0 : index
      %50 = vector.load %arg2[%c0_21, %c0_22, %c0_23] : memref<2x12x64xbf16, #tpu.memory_space<vmem>>, vector<1x12x64xbf16>
      %51 = vector.shape_cast %50 : vector<1x12x64xbf16> to vector<12x64xbf16>
      %cst_24 = arith.constant dense<0.000000e+00> : vector<2x64xf32>
      %52 = tpu.matmul %49, %51, %cst_24 {dimension_numbers = #tpu.dot_dimension_numbers<[1], [0], [0], [1], [0, 0, 1, 1], [], []>} : vector<2x12xbf16>, vector<12x64xbf16>, vector<2x64xf32> -> vector<2x64xf32>
      %53 = arith.truncf %arg7 : vector<2x16xf32> to vector<2x16xbf16>
      %c0_25 = arith.constant 0 : index
      %c0_26 = arith.constant 0 : index
      %c0_27 = arith.constant 0 : index
      %54 = vector.load %arg3[%c0_25, %c0_26, %c0_27] : memref<2x16x64xbf16, #tpu.memory_space<vmem>>, vector<1x16x64xbf16>
      %55 = vector.shape_cast %54 : vector<1x16x64xbf16> to vector<16x64xbf16>
      %cst_28 = arith.constant dense<0.000000e+00> : vector<2x64xf32>
      %56 = tpu.matmul %53, %55, %cst_28 {dimension_numbers = #tpu.dot_dimension_numbers<[1], [0], [0], [1], [0, 0, 1, 1], [], []>} : vector<2x16xbf16>, vector<16x64xbf16>, vector<2x64xf32> -> vector<2x64xf32>
      %57 = arith.addf %52, %56 : vector<2x64xf32>
      %c0_29 = arith.constant 0 : index
      %c0_30 = arith.constant 0 : index
      %c0_31 = arith.constant 0 : index
      %58 = vector.load %arg4[%c0_29, %c0_30, %c0_31] : memref<2x1x64xf32, #tpu.memory_space<vmem>>, vector<1x1x64xf32>
      %59 = vector.shape_cast %58 : vector<1x1x64xf32> to vector<1x64xf32>
      %60 = vector.broadcast %59 : vector<1x64xf32> to vector<2x64xf32>
      %61 = arith.addf %57, %60 : vector<2x64xf32>
      %62 = vector.extract_strided_slice %61 {offsets = [0, 0], sizes = [2, 16], strides = [1, 1]} : vector<2x64xf32> to vector<2x16xf32>
      %63 = arith.negf %62 : vector<2x16xf32>
      %64 = math.exp %63 : vector<2x16xf32>
      %cst_32 = arith.constant 1.000000e+00 : f32
      %65 = vector.broadcast %cst_32 : f32 to vector<2x16xf32>
      %66 = arith.addf %65, %64 : vector<2x16xf32>
      %67 = arith.divf %65, %66 : vector<2x16xf32>
      %68 = vector.extract_strided_slice %61 {offsets = [0, 16], sizes = [2, 16], strides = [1, 1]} : vector<2x64xf32> to vector<2x16xf32>
      %69 = arith.negf %68 : vector<2x16xf32>
      %70 = math.exp %69 : vector<2x16xf32>
      %cst_33 = arith.constant 1.000000e+00 : f32
      %71 = vector.broadcast %cst_33 : f32 to vector<2x16xf32>
      %72 = arith.addf %71, %70 : vector<2x16xf32>
      %73 = arith.divf %71, %72 : vector<2x16xf32>
      %74 = vector.extract_strided_slice %61 {offsets = [0, 32], sizes = [2, 16], strides = [1, 1]} : vector<2x64xf32> to vector<2x16xf32>
      %75 = math.tanh %74 : vector<2x16xf32>
      %76 = vector.extract_strided_slice %61 {offsets = [0, 48], sizes = [2, 16], strides = [1, 1]} : vector<2x64xf32> to vector<2x16xf32>
      %77 = arith.negf %76 : vector<2x16xf32>
      %78 = math.exp %77 : vector<2x16xf32>
      %cst_34 = arith.constant 1.000000e+00 : f32
      %79 = vector.broadcast %cst_34 : f32 to vector<2x16xf32>
      %80 = arith.addf %79, %78 : vector<2x16xf32>
      %81 = arith.divf %79, %80 : vector<2x16xf32>
      %82 = arith.mulf %73, %arg8 : vector<2x16xf32>
      %83 = arith.mulf %67, %75 : vector<2x16xf32>
      %84 = arith.addf %82, %83 : vector<2x16xf32>
      %85 = math.tanh %84 : vector<2x16xf32>
      %86 = arith.mulf %81, %85 : vector<2x16xf32>
      scf.yield %86, %84 : vector<2x16xf32>, vector<2x16xf32>
    }
    %c8_i32_1 = arith.constant 8 : i32
    %c7 = arith.constant 7 : index
    %c0 = arith.constant 0 : index
    %c0_2 = arith.constant 0 : index
    %4 = vector.load %arg1[%c7, %c0, %c0_2] : memref<8x2x12xf32, #tpu.memory_space<vmem>>, vector<1x2x12xf32>
    %5 = vector.shape_cast %4 : vector<1x2x12xf32> to vector<2x12xf32>
    %6 = arith.truncf %5 : vector<2x12xf32> to vector<2x12xbf16>
    %c1 = arith.constant 1 : index
    %c0_3 = arith.constant 0 : index
    %c0_4 = arith.constant 0 : index
    %7 = vector.load %arg2[%c1, %c0_3, %c0_4] : memref<2x12x64xbf16, #tpu.memory_space<vmem>>, vector<1x12x64xbf16>
    %8 = vector.shape_cast %7 : vector<1x12x64xbf16> to vector<12x64xbf16>
    %cst_5 = arith.constant dense<0.000000e+00> : vector<2x64xf32>
    %9 = tpu.matmul %6, %8, %cst_5 {dimension_numbers = #tpu.dot_dimension_numbers<[1], [0], [0], [1], [0, 0, 1, 1], [], []>} : vector<2x12xbf16>, vector<12x64xbf16>, vector<2x64xf32> -> vector<2x64xf32>
    %10 = arith.truncf %0 : vector<2x16xf32> to vector<2x16xbf16>
    %c1_6 = arith.constant 1 : index
    %c0_7 = arith.constant 0 : index
    %c0_8 = arith.constant 0 : index
    %11 = vector.load %arg3[%c1_6, %c0_7, %c0_8] : memref<2x16x64xbf16, #tpu.memory_space<vmem>>, vector<1x16x64xbf16>
    %12 = vector.shape_cast %11 : vector<1x16x64xbf16> to vector<16x64xbf16>
    %cst_9 = arith.constant dense<0.000000e+00> : vector<2x64xf32>
    %13 = tpu.matmul %10, %12, %cst_9 {dimension_numbers = #tpu.dot_dimension_numbers<[1], [0], [0], [1], [0, 0, 1, 1], [], []>} : vector<2x16xbf16>, vector<16x64xbf16>, vector<2x64xf32> -> vector<2x64xf32>
    %14 = arith.addf %9, %13 : vector<2x64xf32>
    %c1_10 = arith.constant 1 : index
    %c0_11 = arith.constant 0 : index
    %c0_12 = arith.constant 0 : index
    %15 = vector.load %arg4[%c1_10, %c0_11, %c0_12] : memref<2x1x64xf32, #tpu.memory_space<vmem>>, vector<1x1x64xf32>
    %16 = vector.shape_cast %15 : vector<1x1x64xf32> to vector<1x64xf32>
    %17 = vector.broadcast %16 : vector<1x64xf32> to vector<2x64xf32>
    %18 = arith.addf %14, %17 : vector<2x64xf32>
    %19 = vector.extract_strided_slice %18 {offsets = [0, 0], sizes = [2, 16], strides = [1, 1]} : vector<2x64xf32> to vector<2x16xf32>
    %20 = arith.negf %19 : vector<2x16xf32>
    %21 = math.exp %20 : vector<2x16xf32>
    %cst_13 = arith.constant 1.000000e+00 : f32
    %22 = vector.broadcast %cst_13 : f32 to vector<2x16xf32>
    %23 = arith.addf %22, %21 : vector<2x16xf32>
    %24 = arith.divf %22, %23 : vector<2x16xf32>
    %25 = vector.extract_strided_slice %18 {offsets = [0, 16], sizes = [2, 16], strides = [1, 1]} : vector<2x64xf32> to vector<2x16xf32>
    %26 = arith.negf %25 : vector<2x16xf32>
    %27 = math.exp %26 : vector<2x16xf32>
    %cst_14 = arith.constant 1.000000e+00 : f32
    %28 = vector.broadcast %cst_14 : f32 to vector<2x16xf32>
    %29 = arith.addf %28, %27 : vector<2x16xf32>
    %30 = arith.divf %28, %29 : vector<2x16xf32>
    %31 = vector.extract_strided_slice %18 {offsets = [0, 32], sizes = [2, 16], strides = [1, 1]} : vector<2x64xf32> to vector<2x16xf32>
    %32 = math.tanh %31 : vector<2x16xf32>
    %33 = vector.extract_strided_slice %18 {offsets = [0, 48], sizes = [2, 16], strides = [1, 1]} : vector<2x64xf32> to vector<2x16xf32>
    %34 = arith.negf %33 : vector<2x16xf32>
    %35 = math.exp %34 : vector<2x16xf32>
    %cst_15 = arith.constant 1.000000e+00 : f32
    %36 = vector.broadcast %cst_15 : f32 to vector<2x16xf32>
    %37 = arith.addf %36, %35 : vector<2x16xf32>
    %38 = arith.divf %36, %37 : vector<2x16xf32>
    %39 = arith.mulf %30, %1 : vector<2x16xf32>
    %40 = arith.mulf %24, %32 : vector<2x16xf32>
    %41 = arith.addf %39, %40 : vector<2x16xf32>
    %42 = math.tanh %41 : vector<2x16xf32>
    %43 = arith.mulf %38, %42 : vector<2x16xf32>
    %c0_16 = arith.constant 0 : index
    %c0_17 = arith.constant 0 : index
    %44 = vector.load %arg5[%c0_16, %c0_17] : memref<2x32xf32, #tpu.memory_space<vmem>>, vector<2x16xf32>
    tpu.vector_store %arg5[%c0_16, %c0_17], %3#0 {strides = array<i32>} : memref<2x32xf32, #tpu.memory_space<vmem>>, vector<2x16xf32>,
    %c0_18 = arith.constant 0 : index
    %c16 = arith.constant 16 : index
    %45 = vector.load %arg5[%c0_18, %c16] : memref<2x32xf32, #tpu.memory_space<vmem>>, vector<2x16xf32>
    tpu.vector_store %arg5[%c0_18, %c16], %43 {strides = array<i32>} : memref<2x32xf32, #tpu.memory_space<vmem>>, vector<2x16xf32>,
    return
  }
  func.func @transform_0(%arg0: i32) -> (i32, i32, i32) {
    %c0_i32 = arith.constant 0 : i32
    %c0_i32_0 = arith.constant 0 : i32
    %c0_i32_1 = arith.constant 0 : i32
    %c0_i32_2 = arith.constant 0 : i32
    return %c0_i32, %c0_i32_0, %c0_i32_1 : i32, i32, i32
  }
  func.func @transform_1(%arg0: i32) -> (i32, i32, i32) {
    %c0_i32 = arith.constant 0 : i32
    %c0_i32_0 = arith.constant 0 : i32
    %c0_i32_1 = arith.constant 0 : i32
    %c0_i32_2 = arith.constant 0 : i32
    return %c0_i32, %c0_i32_0, %c0_i32_1 : i32, i32, i32
  }
  func.func @transform_2(%arg0: i32) -> (i32, i32, i32) {
    %c0_i32 = arith.constant 0 : i32
    %c0_i32_0 = arith.constant 0 : i32
    %c0_i32_1 = arith.constant 0 : i32
    %c0_i32_2 = arith.constant 0 : i32
    return %c0_i32, %c0_i32_0, %c0_i32_1 : i32, i32, i32
  }
  func.func @transform_3(%arg0: i32) -> (i32, i32, i32) {
    %c0_i32 = arith.constant 0 : i32
    %c0_i32_0 = arith.constant 0 : i32
    %c0_i32_1 = arith.constant 0 : i32
    %c0_i32_2 = arith.constant 0 : i32
    return %c0_i32, %c0_i32_0, %c0_i32_1 : i32, i32, i32
  }
  func.func @transform_4(%arg0: i32) -> (i32, i32) {
    %c0_i32 = arith.constant 0 : i32
    %c0_i32_0 = arith.constant 0 : i32
    %c0_i32_1 = arith.constant 0 : i32
    return %c0_i32, %c0_i32_0 : i32, i32
  }
}

module attributes {stable_mosaic.version = 11 : i64} {
  func.func @_gru_fc_kernel(%arg0: i32, %arg1: memref<8x2x32xf32, #tpu.memory_space<vmem>>, %arg2: memref<32x48xbf16, #tpu.memory_space<vmem>>, %arg3: memref<16x48xbf16, #tpu.memory_space<vmem>>, %arg4: memref<1x48xf32, #tpu.memory_space<vmem>>, %arg5: memref<1x48xf32, #tpu.memory_space<vmem>>, %arg6: memref<16x4xbf16, #tpu.memory_space<vmem>>, %arg7: memref<1x4xf32, #tpu.memory_space<vmem>>, %arg8: memref<8x2x4xf32, #tpu.memory_space<vmem>>) attributes {dimension_semantics = [#tpu.dimension_semantics<arbitrary>], iteration_bounds = array<i64: 1>, scalar_prefetch = 0 : i64, scratch_operands = 0 : i64, tpu.core_type = #tpu.core_type<tc>, window_params = [{pipeline_mode = #tpu.pipeline_mode<synchronous>, transform_indices = @transform_0, window_bounds = array<i64: 8, 2, 32>}, {pipeline_mode = #tpu.pipeline_mode<synchronous>, transform_indices = @transform_1, window_bounds = array<i64: 32, 48>}, {pipeline_mode = #tpu.pipeline_mode<synchronous>, transform_indices = @transform_2, window_bounds = array<i64: 16, 48>}, {pipeline_mode = #tpu.pipeline_mode<synchronous>, transform_indices = @transform_3, window_bounds = array<i64: 1, 48>}, {pipeline_mode = #tpu.pipeline_mode<synchronous>, transform_indices = @transform_4, window_bounds = array<i64: 1, 48>}, {pipeline_mode = #tpu.pipeline_mode<synchronous>, transform_indices = @transform_5, window_bounds = array<i64: 16, 4>}, {pipeline_mode = #tpu.pipeline_mode<synchronous>, transform_indices = @transform_6, window_bounds = array<i64: 1, 4>}, {pipeline_mode = #tpu.pipeline_mode<synchronous>, transform_indices = @transform_7, window_bounds = array<i64: 8, 2, 4>}]} {
    %cst = arith.constant 0.000000e+00 : f32
    %0 = vector.broadcast %cst : f32 to vector<2x16xf32>
    %c0_i32 = arith.constant 0 : i32
    %c8_i32 = arith.constant 8 : i32
    %1 = arith.addi %c0_i32, %c8_i32 : i32
    %c1_i32 = arith.constant 1 : i32
    %2 = scf.for %arg9 = %c0_i32 to %1 step %c1_i32 iter_args(%arg10 = %0) -> (vector<2x16xf32>)  : i32 {
      %3 = arith.index_cast %arg9 : i32 to index
      %c0 = arith.constant 0 : index
      %c0_1 = arith.constant 0 : index
      %4 = vector.load %arg1[%3, %c0, %c0_1] : memref<8x2x32xf32, #tpu.memory_space<vmem>>, vector<1x2x32xf32>
      %5 = vector.shape_cast %4 : vector<1x2x32xf32> to vector<2x32xf32>
      %6 = arith.truncf %5 : vector<2x32xf32> to vector<2x32xbf16>
      %c0_2 = arith.constant 0 : index
      %c0_3 = arith.constant 0 : index
      %7 = vector.load %arg2[%c0_2, %c0_3] : memref<32x48xbf16, #tpu.memory_space<vmem>>, vector<32x48xbf16>
      %cst_4 = arith.constant dense<0.000000e+00> : vector<2x48xf32>
      %8 = tpu.matmul %6, %7, %cst_4 {dimension_numbers = #tpu.dot_dimension_numbers<[1], [0], [0], [1], [0, 0, 1, 1], [], []>} : vector<2x32xbf16>, vector<32x48xbf16>, vector<2x48xf32> -> vector<2x48xf32>
      %c0_5 = arith.constant 0 : index
      %c0_6 = arith.constant 0 : index
      %9 = vector.load %arg4[%c0_5, %c0_6] : memref<1x48xf32, #tpu.memory_space<vmem>>, vector<1x48xf32>
      %10 = vector.broadcast %9 : vector<1x48xf32> to vector<2x48xf32>
      %11 = arith.addf %8, %10 : vector<2x48xf32>
      %12 = arith.truncf %arg10 : vector<2x16xf32> to vector<2x16xbf16>
      %c0_7 = arith.constant 0 : index
      %c0_8 = arith.constant 0 : index
      %13 = vector.load %arg3[%c0_7, %c0_8] : memref<16x48xbf16, #tpu.memory_space<vmem>>, vector<16x48xbf16>
      %cst_9 = arith.constant dense<0.000000e+00> : vector<2x48xf32>
      %14 = tpu.matmul %12, %13, %cst_9 {dimension_numbers = #tpu.dot_dimension_numbers<[1], [0], [0], [1], [0, 0, 1, 1], [], []>} : vector<2x16xbf16>, vector<16x48xbf16>, vector<2x48xf32> -> vector<2x48xf32>
      %c0_10 = arith.constant 0 : index
      %c0_11 = arith.constant 0 : index
      %15 = vector.load %arg5[%c0_10, %c0_11] : memref<1x48xf32, #tpu.memory_space<vmem>>, vector<1x48xf32>
      %16 = vector.broadcast %15 : vector<1x48xf32> to vector<2x48xf32>
      %17 = arith.addf %14, %16 : vector<2x48xf32>
      %18 = vector.extract_strided_slice %11 {offsets = [0, 0], sizes = [2, 16], strides = [1, 1]} : vector<2x48xf32> to vector<2x16xf32>
      %19 = vector.extract_strided_slice %17 {offsets = [0, 0], sizes = [2, 16], strides = [1, 1]} : vector<2x48xf32> to vector<2x16xf32>
      %20 = arith.addf %18, %19 : vector<2x16xf32>
      %21 = arith.negf %20 : vector<2x16xf32>
      %22 = math.exp %21 : vector<2x16xf32>
      %cst_12 = arith.constant 1.000000e+00 : f32
      %23 = vector.broadcast %cst_12 : f32 to vector<2x16xf32>
      %24 = arith.addf %23, %22 : vector<2x16xf32>
      %25 = arith.divf %23, %24 : vector<2x16xf32>
      %26 = vector.extract_strided_slice %11 {offsets = [0, 16], sizes = [2, 16], strides = [1, 1]} : vector<2x48xf32> to vector<2x16xf32>
      %27 = vector.extract_strided_slice %17 {offsets = [0, 16], sizes = [2, 16], strides = [1, 1]} : vector<2x48xf32> to vector<2x16xf32>
      %28 = arith.addf %26, %27 : vector<2x16xf32>
      %29 = arith.negf %28 : vector<2x16xf32>
      %30 = math.exp %29 : vector<2x16xf32>
      %cst_13 = arith.constant 1.000000e+00 : f32
      %31 = vector.broadcast %cst_13 : f32 to vector<2x16xf32>
      %32 = arith.addf %31, %30 : vector<2x16xf32>
      %33 = arith.divf %31, %32 : vector<2x16xf32>
      %34 = vector.extract_strided_slice %11 {offsets = [0, 32], sizes = [2, 16], strides = [1, 1]} : vector<2x48xf32> to vector<2x16xf32>
      %35 = vector.extract_strided_slice %17 {offsets = [0, 32], sizes = [2, 16], strides = [1, 1]} : vector<2x48xf32> to vector<2x16xf32>
      %36 = arith.mulf %25, %35 : vector<2x16xf32>
      %37 = arith.addf %34, %36 : vector<2x16xf32>
      %38 = math.tanh %37 : vector<2x16xf32>
      %cst_14 = arith.constant 1.000000e+00 : f32
      %39 = vector.broadcast %cst_14 : f32 to vector<2x16xf32>
      %40 = arith.subf %39, %33 : vector<2x16xf32>
      %41 = arith.mulf %40, %38 : vector<2x16xf32>
      %42 = arith.mulf %33, %arg10 : vector<2x16xf32>
      %43 = arith.addf %41, %42 : vector<2x16xf32>
      %44 = arith.truncf %43 : vector<2x16xf32> to vector<2x16xbf16>
      %c0_15 = arith.constant 0 : index
      %c0_16 = arith.constant 0 : index
      %45 = vector.load %arg6[%c0_15, %c0_16] : memref<16x4xbf16, #tpu.memory_space<vmem>>, vector<16x4xbf16>
      %cst_17 = arith.constant dense<0.000000e+00> : vector<2x4xf32>
      %46 = tpu.matmul %44, %45, %cst_17 {dimension_numbers = #tpu.dot_dimension_numbers<[1], [0], [0], [1], [0, 0, 1, 1], [], []>} : vector<2x16xbf16>, vector<16x4xbf16>, vector<2x4xf32> -> vector<2x4xf32>
      %c0_18 = arith.constant 0 : index
      %c0_19 = arith.constant 0 : index
      %47 = vector.load %arg7[%c0_18, %c0_19] : memref<1x4xf32, #tpu.memory_space<vmem>>, vector<1x4xf32>
      %48 = vector.broadcast %47 : vector<1x4xf32> to vector<2x4xf32>
      %49 = arith.addf %46, %48 : vector<2x4xf32>
      %50 = arith.index_cast %arg9 : i32 to index
      %c0_20 = arith.constant 0 : index
      %c0_21 = arith.constant 0 : index
      %51 = vector.load %arg8[%50, %c0_20, %c0_21] : memref<8x2x4xf32, #tpu.memory_space<vmem>>, vector<1x2x4xf32>
      %52 = vector.shape_cast %51 : vector<1x2x4xf32> to vector<2x4xf32>
      %53 = vector.shape_cast %49 : vector<2x4xf32> to vector<1x2x4xf32>
      tpu.vector_store %arg8[%50, %c0_20, %c0_21], %53 {strides = array<i32>} : memref<8x2x4xf32, #tpu.memory_space<vmem>>, vector<1x2x4xf32>,
      scf.yield %43 : vector<2x16xf32>
    }
    %c8_i32_0 = arith.constant 8 : i32
    return
  }
  func.func @transform_0(%arg0: i32) -> (i32, i32, i32) {
    %c0_i32 = arith.constant 0 : i32
    %c0_i32_0 = arith.constant 0 : i32
    %c0_i32_1 = arith.constant 0 : i32
    %c0_i32_2 = arith.constant 0 : i32
    return %c0_i32, %c0_i32_0, %c0_i32_1 : i32, i32, i32
  }
  func.func @transform_1(%arg0: i32) -> (i32, i32) {
    %c0_i32 = arith.constant 0 : i32
    %c0_i32_0 = arith.constant 0 : i32
    %c0_i32_1 = arith.constant 0 : i32
    return %c0_i32, %c0_i32_0 : i32, i32
  }
  func.func @transform_2(%arg0: i32) -> (i32, i32) {
    %c0_i32 = arith.constant 0 : i32
    %c0_i32_0 = arith.constant 0 : i32
    %c0_i32_1 = arith.constant 0 : i32
    return %c0_i32, %c0_i32_0 : i32, i32
  }
  func.func @transform_3(%arg0: i32) -> (i32, i32) {
    %c0_i32 = arith.constant 0 : i32
    %c0_i32_0 = arith.constant 0 : i32
    %c0_i32_1 = arith.constant 0 : i32
    return %c0_i32, %c0_i32_0 : i32, i32
  }
  func.func @transform_4(%arg0: i32) -> (i32, i32) {
    %c0_i32 = arith.constant 0 : i32
    %c0_i32_0 = arith.constant 0 : i32
    %c0_i32_1 = arith.constant 0 : i32
    return %c0_i32, %c0_i32_0 : i32, i32
  }
  func.func @transform_5(%arg0: i32) -> (i32, i32) {
    %c0_i32 = arith.constant 0 : i32
    %c0_i32_0 = arith.constant 0 : i32
    %c0_i32_1 = arith.constant 0 : i32
    return %c0_i32, %c0_i32_0 : i32, i32
  }
  func.func @transform_6(%arg0: i32) -> (i32, i32) {
    %c0_i32 = arith.constant 0 : i32
    %c0_i32_0 = arith.constant 0 : i32
    %c0_i32_1 = arith.constant 0 : i32
    return %c0_i32, %c0_i32_0 : i32, i32
  }
  func.func @transform_7(%arg0: i32) -> (i32, i32, i32) {
    %c0_i32 = arith.constant 0 : i32
    %c0_i32_0 = arith.constant 0 : i32
    %c0_i32_1 = arith.constant 0 : i32
    %c0_i32_2 = arith.constant 0 : i32
    return %c0_i32, %c0_i32_0, %c0_i32_1 : i32, i32, i32
  }
}

module attributes {stable_mosaic.version = 11 : i64} {
  func.func @_mlp_kernel(%arg0: i32, %arg1: memref<2x32xf32, #tpu.memory_space<vmem>>, %arg2: memref<32x16xbf16, #tpu.memory_space<vmem>>, %arg3: memref<1x16xf32, #tpu.memory_space<vmem>>, %arg4: memref<16x16xbf16, #tpu.memory_space<vmem>>, %arg5: memref<1x16xf32, #tpu.memory_space<vmem>>, %arg6: memref<16x16xbf16, #tpu.memory_space<vmem>>, %arg7: memref<1x16xf32, #tpu.memory_space<vmem>>, %arg8: memref<16x4xbf16, #tpu.memory_space<vmem>>, %arg9: memref<1x4xf32, #tpu.memory_space<vmem>>, %arg10: memref<2x4xf32, #tpu.memory_space<vmem>>) attributes {dimension_semantics = [#tpu.dimension_semantics<arbitrary>], iteration_bounds = array<i64: 1>, scalar_prefetch = 0 : i64, scratch_operands = 0 : i64, tpu.core_type = #tpu.core_type<tc>, window_params = [{pipeline_mode = #tpu.pipeline_mode<synchronous>, transform_indices = @transform_0, window_bounds = array<i64: 2, 32>}, {pipeline_mode = #tpu.pipeline_mode<synchronous>, transform_indices = @transform_1, window_bounds = array<i64: 32, 16>}, {pipeline_mode = #tpu.pipeline_mode<synchronous>, transform_indices = @transform_2, window_bounds = array<i64: 1, 16>}, {pipeline_mode = #tpu.pipeline_mode<synchronous>, transform_indices = @transform_3, window_bounds = array<i64: 16, 16>}, {pipeline_mode = #tpu.pipeline_mode<synchronous>, transform_indices = @transform_4, window_bounds = array<i64: 1, 16>}, {pipeline_mode = #tpu.pipeline_mode<synchronous>, transform_indices = @transform_5, window_bounds = array<i64: 16, 16>}, {pipeline_mode = #tpu.pipeline_mode<synchronous>, transform_indices = @transform_6, window_bounds = array<i64: 1, 16>}, {pipeline_mode = #tpu.pipeline_mode<synchronous>, transform_indices = @transform_7, window_bounds = array<i64: 16, 4>}, {pipeline_mode = #tpu.pipeline_mode<synchronous>, transform_indices = @transform_8, window_bounds = array<i64: 1, 4>}, {pipeline_mode = #tpu.pipeline_mode<synchronous>, transform_indices = @transform_9, window_bounds = array<i64: 2, 4>}]} {
    %c0 = arith.constant 0 : index
    %c0_0 = arith.constant 0 : index
    %0 = vector.load %arg1[%c0, %c0_0] : memref<2x32xf32, #tpu.memory_space<vmem>>, vector<2x32xf32>
    %c0_1 = arith.constant 0 : index
    %c0_2 = arith.constant 0 : index
    %1 = vector.load %arg2[%c0_1, %c0_2] : memref<32x16xbf16, #tpu.memory_space<vmem>>, vector<32x16xbf16>
    %c0_3 = arith.constant 0 : index
    %c0_4 = arith.constant 0 : index
    %2 = vector.load %arg3[%c0_3, %c0_4] : memref<1x16xf32, #tpu.memory_space<vmem>>, vector<1x16xf32>
    %3 = arith.truncf %0 : vector<2x32xf32> to vector<2x32xbf16>
    %cst = arith.constant dense<0.000000e+00> : vector<2x16xf32>
    %4 = tpu.matmul %3, %1, %cst {dimension_numbers = #tpu.dot_dimension_numbers<[1], [0], [0], [1], [0, 0, 1, 1], [], []>} : vector<2x32xbf16>, vector<32x16xbf16>, vector<2x16xf32> -> vector<2x16xf32>
    %5 = vector.broadcast %2 : vector<1x16xf32> to vector<2x16xf32>
    %6 = arith.addf %4, %5 : vector<2x16xf32>
    %cst_5 = arith.constant 0.000000e+00 : f32
    %7 = vector.broadcast %cst_5 : f32 to vector<2x16xf32>
    %8 = arith.maximumf %6, %7 : vector<2x16xf32>
    %c0_6 = arith.constant 0 : index
    %c0_7 = arith.constant 0 : index
    %9 = vector.load %arg4[%c0_6, %c0_7] : memref<16x16xbf16, #tpu.memory_space<vmem>>, vector<16x16xbf16>
    %c0_8 = arith.constant 0 : index
    %c0_9 = arith.constant 0 : index
    %10 = vector.load %arg5[%c0_8, %c0_9] : memref<1x16xf32, #tpu.memory_space<vmem>>, vector<1x16xf32>
    %11 = arith.truncf %8 : vector<2x16xf32> to vector<2x16xbf16>
    %cst_10 = arith.constant dense<0.000000e+00> : vector<2x16xf32>
    %12 = tpu.matmul %11, %9, %cst_10 {dimension_numbers = #tpu.dot_dimension_numbers<[1], [0], [0], [1], [0, 0, 1, 1], [], []>} : vector<2x16xbf16>, vector<16x16xbf16>, vector<2x16xf32> -> vector<2x16xf32>
    %13 = vector.broadcast %10 : vector<1x16xf32> to vector<2x16xf32>
    %14 = arith.addf %12, %13 : vector<2x16xf32>
    %cst_11 = arith.constant 0.000000e+00 : f32
    %15 = vector.broadcast %cst_11 : f32 to vector<2x16xf32>
    %16 = arith.maximumf %14, %15 : vector<2x16xf32>
    %c0_12 = arith.constant 0 : index
    %c0_13 = arith.constant 0 : index
    %17 = vector.load %arg6[%c0_12, %c0_13] : memref<16x16xbf16, #tpu.memory_space<vmem>>, vector<16x16xbf16>
    %c0_14 = arith.constant 0 : index
    %c0_15 = arith.constant 0 : index
    %18 = vector.load %arg7[%c0_14, %c0_15] : memref<1x16xf32, #tpu.memory_space<vmem>>, vector<1x16xf32>
    %19 = arith.truncf %16 : vector<2x16xf32> to vector<2x16xbf16>
    %cst_16 = arith.constant dense<0.000000e+00> : vector<2x16xf32>
    %20 = tpu.matmul %19, %17, %cst_16 {dimension_numbers = #tpu.dot_dimension_numbers<[1], [0], [0], [1], [0, 0, 1, 1], [], []>} : vector<2x16xbf16>, vector<16x16xbf16>, vector<2x16xf32> -> vector<2x16xf32>
    %21 = vector.broadcast %18 : vector<1x16xf32> to vector<2x16xf32>
    %22 = arith.addf %20, %21 : vector<2x16xf32>
    %cst_17 = arith.constant 0.000000e+00 : f32
    %23 = vector.broadcast %cst_17 : f32 to vector<2x16xf32>
    %24 = arith.maximumf %22, %23 : vector<2x16xf32>
    %c0_18 = arith.constant 0 : index
    %c0_19 = arith.constant 0 : index
    %25 = vector.load %arg8[%c0_18, %c0_19] : memref<16x4xbf16, #tpu.memory_space<vmem>>, vector<16x4xbf16>
    %c0_20 = arith.constant 0 : index
    %c0_21 = arith.constant 0 : index
    %26 = vector.load %arg9[%c0_20, %c0_21] : memref<1x4xf32, #tpu.memory_space<vmem>>, vector<1x4xf32>
    %27 = arith.truncf %24 : vector<2x16xf32> to vector<2x16xbf16>
    %cst_22 = arith.constant dense<0.000000e+00> : vector<2x4xf32>
    %28 = tpu.matmul %27, %25, %cst_22 {dimension_numbers = #tpu.dot_dimension_numbers<[1], [0], [0], [1], [0, 0, 1, 1], [], []>} : vector<2x16xbf16>, vector<16x4xbf16>, vector<2x4xf32> -> vector<2x4xf32>
    %29 = vector.broadcast %26 : vector<1x4xf32> to vector<2x4xf32>
    %30 = arith.addf %28, %29 : vector<2x4xf32>
    %c0_23 = arith.constant 0 : index
    %c0_24 = arith.constant 0 : index
    %31 = vector.load %arg10[%c0_23, %c0_24] : memref<2x4xf32, #tpu.memory_space<vmem>>, vector<2x4xf32>
    tpu.vector_store %arg10[%c0_23, %c0_24], %30 {strides = array<i32>} : memref<2x4xf32, #tpu.memory_space<vmem>>, vector<2x4xf32>,
    return
  }
  func.func @transform_0(%arg0: i32) -> (i32, i32) {
    %c0_i32 = arith.constant 0 : i32
    %c0_i32_0 = arith.constant 0 : i32
    %c0_i32_1 = arith.constant 0 : i32
    return %c0_i32, %c0_i32_0 : i32, i32
  }
  func.func @transform_1(%arg0: i32) -> (i32, i32) {
    %c0_i32 = arith.constant 0 : i32
    %c0_i32_0 = arith.constant 0 : i32
    %c0_i32_1 = arith.constant 0 : i32
    return %c0_i32, %c0_i32_0 : i32, i32
  }
  func.func @transform_2(%arg0: i32) -> (i32, i32) {
    %c0_i32 = arith.constant 0 : i32
    %c0_i32_0 = arith.constant 0 : i32
    %c0_i32_1 = arith.constant 0 : i32
    return %c0_i32, %c0_i32_0 : i32, i32
  }
  func.func @transform_3(%arg0: i32) -> (i32, i32) {
    %c0_i32 = arith.constant 0 : i32
    %c0_i32_0 = arith.constant 0 : i32
    %c0_i32_1 = arith.constant 0 : i32
    return %c0_i32, %c0_i32_0 : i32, i32
  }
  func.func @transform_4(%arg0: i32) -> (i32, i32) {
    %c0_i32 = arith.constant 0 : i32
    %c0_i32_0 = arith.constant 0 : i32
    %c0_i32_1 = arith.constant 0 : i32
    return %c0_i32, %c0_i32_0 : i32, i32
  }
  func.func @transform_5(%arg0: i32) -> (i32, i32) {
    %c0_i32 = arith.constant 0 : i32
    %c0_i32_0 = arith.constant 0 : i32
    %c0_i32_1 = arith.constant 0 : i32
    return %c0_i32, %c0_i32_0 : i32, i32
  }
  func.func @transform_6(%arg0: i32) -> (i32, i32) {
    %c0_i32 = arith.constant 0 : i32
    %c0_i32_0 = arith.constant 0 : i32
    %c0_i32_1 = arith.constant 0 : i32
    return %c0_i32, %c0_i32_0 : i32, i32
  }
  func.func @transform_7(%arg0: i32) -> (i32, i32) {
    %c0_i32 = arith.constant 0 : i32
    %c0_i32_0 = arith.constant 0 : i32
    %c0_i32_1 = arith.constant 0 : i32
    return %c0_i32, %c0_i32_0 : i32, i32
  }
  func.func @transform_8(%arg0: i32) -> (i32, i32) {
    %c0_i32 = arith.constant 0 : i32
    %c0_i32_0 = arith.constant 0 : i32
    %c0_i32_1 = arith.constant 0 : i32
    return %c0_i32, %c0_i32_0 : i32, i32
  }
  func.func @transform_9(%arg0: i32) -> (i32, i32) {
    %c0_i32 = arith.constant 0 : i32
    %c0_i32_0 = arith.constant 0 : i32
    %c0_i32_1 = arith.constant 0 : i32
    return %c0_i32, %c0_i32_0 : i32, i32
  }
}

</mosaic_0001>

<bundles_post_ra>
// kernel: stgat_forward.6
= control target key start
LH: loop header
LB: loop body
LE: loop exit
PB: predicated region body
PF: predicated region fallthrough
CT: control target
= control target key end

     0   :  { %s807_s12 = smov 0   ;;  %s930_s0 = inlined_call_operand.vmem [shape: f32[2,14,4], index: 0, kind: input, shape index: {}]   ;;  %s931_s1 = inlined_call_operand.vmem [shape: bf16[2,7,4,4], index: 1, kind: input, shape index: {}]   ;;  %s932_s2 = inlined_call_operand.vmem [shape: f32[2,1,4], index: 2, kind: input, shape index: {}]   ;;  %s933_s3 = inlined_call_operand.vmem [shape: f32[2,2,8,4], index: 3, kind: output, shape index: {}]  }
   0x1 LB: > { %s685_s13 = sadd.s32 4294967295, %s783_s12   ;;  %p689_p0 = scmp.ge.s32.totalorder %s783_s12, 1  ;;  %s783_s12 = sphi %s807_s12, %s13_s12  }
   0x2   : > { %p145_p1 = scmp.lt.s32.totalorder %s783_s12, 3 }
   0x4   : > { %p146_p2 = pnand %p689_p0, %p145_p1 }
   0x5   : > { %p172_p3 = scmp.lt.s32.totalorder (!%p146_p2), %s685_s13, 1  ;;  %v818_v0 = vld [vmem:[%s930_s0] sm:$0xff] (!%p146_p2)  ;;  %v823_v1 = vld [vmem:[%s930_s0 + $0x10] sm:$0xff] (!%p146_p2)  ;;  %v785_v2 = vmov (!%p146_p2), 0.0   ;;  %v830_v3 = vld [vmem:[%s930_s0 + $0x8] sm:$0x3f] (!%p146_p2) }
   0x6   : > { %149 = sbr.rel (%p146_p2) target bundleno = 267 (0x10b), region = 32  ;;  %724 = vmatprep.subr.bf16.mxu0 (!%p146_p2), %v785_v2  ;;  %730 = vmatprep.subr.bf16.mxu1 (!%p146_p2), %v785_v2  ;;  %v835_v4 = vld [vmem:[%s930_s0 + $0x18] sm:$0x3f] (!%p146_p2)  ;;  %vm196_vm0 = vcmask (!%p146_p2), 1046528   ;;  %v197_v5 = vrot.slane (!%p146_p2), %v818_v0, 1  ;;  %vm786_vm1 = vmmov (!%p146_p2), 0   ;;  %v190_v20 = vpack.c.bf16 (!%p146_p2), %v823_v1, %v818_v0 }
   0x7   : > { %726 = vmatprep.mubr.msk.bf16.mxu0 (!%p146_p2), %vm786_vm1, %v785_v2  ;;  %732 = vmatprep.mubr.msk.bf16.mxu1 (!%p146_p2), %vm786_vm1, %v785_v2  ;;  %v198_v6 = vrot.slane (!%p146_p2), %v830_v3, 1  ;;  %v200_v7 = vrot.slane (!%p146_p2), %v823_v1, 1  ;;  %v201_v8 = vrot.slane (!%p146_p2), %v835_v4, 1  ;;  %vm212_vm2 = vcmask (!%p146_p2), 1041408  }
   0x8   : > { %vm304_vm3 = vcmask (!%p146_p2), 1045504   ;;  %v305_v11 = vrot.slane (!%p146_p2), %v818_v0, 2  ;;  %v306_v12 = vrot.slane (!%p146_p2), %v830_v3, 2  ;;  %v308_v13 = vrot.slane (!%p146_p2), %v823_v1, 2 }
   0x9   : > { %v199_v9 = vsel (!%p146_p2), %vm196_vm0, %v197_v5, %v198_v6  ;;  %v202_v10 = vsel (!%p146_p2), %vm196_vm0, %v200_v7, %v201_v8  ;;  %v309_v14 = vrot.slane (!%p146_p2), %v835_v4, 2  ;;  %v366_v15 = vrot.slane (!%p146_p2), %v818_v0, 3 }
   0xa   : > { %v367_v16 = vrot.slane (!%p146_p2), %v830_v3, 3  ;;  %v205_v19 = vpack.c.bf16 (!%p146_p2), %v202_v10, %v199_v9  ;;  %v369_v25 = vrot.slane (!%p146_p2), %v823_v1, 3  ;;  %v370_v26 = vrot.slane (!%p146_p2), %v835_v4, 3 }
   0xb   : > { %vm208_vm4 = vcmask (!%p146_p2), 31744   ;;  %vm365_vm5 = vcmask (!%p146_p2), 1044480   ;;  %v307_v29 = vsel (!%p146_p2), %vm304_vm3, %v305_v11, %v306_v12  ;;  %v310_v30 = vsel (!%p146_p2), %vm304_vm3, %v308_v13, %v309_v14 }
   0xc   : > { %v368_v31 = vsel (!%p146_p2), %vm365_vm5, %v366_v15, %v367_v16  ;;  %v371_v32 = vsel (!%p146_p2), %vm365_vm5, %v369_v25, %v370_v26  ;;  %v313_v33 = vpack.c.bf16 (!%p146_p2), %v310_v30, %v307_v29  ;;  %vm426_vm6 = vcmask (!%p146_p2), 1043456  }
   0xd   : > { %s935_s13 = smov (!%p172_p3, %s685_s13), 1  ;;  %v374_v35 = vpack.c.bf16 %v371_v32, %v368_v31  ;;  %v427_v37 = vrot.slane %v818_v0, 4  ;;  %v428_v38 = vrot.slane %v830_v3, 4  ;;  %v430_v39 = vrot.slane %v823_v1, 4 }
   0xe   : > { %s766_s22 = smul.u32 14, %s935_s13  ;;  %v431_v40 = vrot.slane %v835_v4, 4  ;;  %v488_v41 = vrot.slane %v818_v0, 5  ;;  %v489_v42 = vrot.slane %v830_v3, 5  ;;  %v491_v43 = vrot.slane %v823_v1, 5  ;;  %s179_s28 = scalar_lea.vmem %s932_s2, %s935_s13 }
   0xf   : > { %v492_v44 = vrot.slane %v835_v4, 5  ;;  %vm487_vm7 = vcmask 1042432   ;;  %v429_v47 = vsel %vm426_vm6, %v427_v37, %v428_v38  ;;  %v548_v54 = vrot.slane %v818_v0, 6  ;;  %s709_s29 = sshll.u32 %s935_s13, 4 }
  0x10   : > { %s853_s25 = scalar_lea.vmem %s931_s1, %s766_s22  ;;  %v432_v48 = vsel %vm426_vm6, %v430_v39, %v431_v40  ;;  %v490_v49 = vsel %vm487_vm7, %v488_v41, %v489_v42  ;;  %v549_v55 = vrot.slane %v830_v3, 6  ;;  %v551_v56 = vrot.slane %v823_v1, 6  ;;  %s184_s5 = scalar_lea.vmem %s933_s3, %s709_s29 }
  0x11   : > { %v693_v17 = vld [vmem:[%s853_s25 + $0x2] sm:$0x3]  ;;  %v191_v18 = vld [vmem:[%s853_s25] sm:$0x3]  ;;  %v696_v21 = vld [vmem:[%s853_s25 + $0x4] sm:$0x3]  ;;  %v493_v50 = vsel %vm487_vm7, %v491_v43, %v492_v44  ;;  %v435_v52 = vpack.c.bf16 %v432_v48, %v429_v47 }
  0x12   : > { %v214_v22 = vsel %vm212_vm2, %v693_v17, 0  ;;  %v261_v23 = vsel %vm212_vm2, %v191_v18, 0  ;;  %v698_v24 = vld [vmem:[%s853_s25 + $0x6] sm:$0x3]  ;;  %v320_v27 = vsel %vm212_vm2, %v696_v21, 0  ;;  %v496_v53 = vpack.c.bf16 %v493_v50, %v490_v49 }
  0x13   : > { %725 = vmatpush3.bf16.msra.mxu0 %v214_v22  ;;  %731 = vmatpush3.bf16.msra.mxu1 %v261_v23  ;;  %v381_v28 = vsel %vm212_vm2, %v698_v24, 0  ;;  %v700_v34 = vld [vmem:[%s853_s25 + $0x8] sm:$0x3]  ;;  %v702_v36 = vld [vmem:[%s853_s25 + $0xa] sm:$0x3]  ;;  %v552_v57 = vrot.slane %v835_v4, 6  ;;  %v550_v59 = vsel %vm212_vm2, %v548_v54, %v549_v55 }
  0x14   : > { %736 = vmatprep.subr.bf16.mxu0 %v785_v2  ;;  %742 = vmatprep.subr.bf16.mxu1 %v785_v2  ;;  %v442_v45 = vsel %vm212_vm2, %v700_v34, 0  ;;  %v503_v46 = vsel %vm212_vm2, %v702_v36, 0  ;;  %v704_v51 = vld [vmem:[%s853_s25 + $0xc] sm:$0x3] }
  0x15   : > { %v563_v58 = vsel %vm212_vm2, %v704_v51, 0  ;;  %v553_v60 = vsel %vm212_vm2, %v551_v56, %v552_v57 }
  0x16   : > { %727 = vmatmul.mubr.msk.bf16.vlgmr.msra.gmra.mrb[0].mxu0 %vm208_vm4, %v205_v19  ;;  %733 = vmatmul.mubr.msk.bf16.vlgmr.msra.gmra.mrb[0].mxu1 %vm208_vm4, %v190_v20  ;;  %v556_v61 = vpack.c.bf16 %v553_v60, %v550_v59 }
  0x17   : > { %737 = vmatpush3.bf16.msra.mxu0 %v320_v27  ;;  %738 = vmatprep.mubr.msk.bf16.mxu0 %vm786_vm1, %v785_v2 }
  0x18   : > { %743 = vmatpush3.bf16.msra.mxu1 %v381_v28  ;;  %748 = vmatprep.subr.bf16.mxu0 %v785_v2 }
  0x19   : > { %744 = vmatprep.mubr.msk.bf16.mxu1 %vm786_vm1, %v785_v2  ;;  %754 = vmatprep.subr.bf16.mxu1 %v785_v2 }
  0x1e   : > { %739 = vmatmul.mubr.msk.bf16.vlgmr.msra.gmra.mrb[4].mxu0 %vm208_vm4, %v313_v33  ;;  %745 = vmatmul.mubr.msk.bf16.vlgmr.msra.gmra.mrb[4].mxu1 %vm208_vm4, %v374_v35  ;;  %v706_v33 = vld [vmem:[%s179_s28] ss:$0 sm:$0xff] }
  0x1f   : > { %749 = vmatpush3.bf16.msra.mxu0 %v442_v45  ;;  %750 = vmatprep.mubr.msk.bf16.mxu0 %vm786_vm1, %v785_v2 }
  0x20   : > { %755 = vmatpush3.bf16.msra.mxu1 %v503_v46  ;;  %760 = vmatprep.subr.bf16.mxu0 %v785_v2 }
  0x21   : > { %756 = vmatprep.mubr.msk.bf16.mxu1 %vm786_vm1, %v785_v2 }
  0x26   : > { %751 = vmatmul.mubr.msk.bf16.vlgmr.msra.gmra.mrb[8].mxu0 %vm208_vm4, %v435_v52  ;;  %757 = vmatmul.mubr.msk.bf16.vlgmr.msra.gmra.mrb[8].mxu1 %vm208_vm4, %v496_v53 }
  0x27   : > { %761 = vmatpush3.bf16.msra.mxu0 %v563_v58  ;;  %762 = vmatprep.mubr.msk.bf16.mxu0 %vm786_vm1, %v785_v2 }
  0x2e   : > { %763 = vmatmul.mubr.msk.bf16.vlgmr.msra.gmra.mrb[12].mxu0 %vm208_vm4, %v556_v61 }
  0xe9   : > { %v250_v62 = vpop.f32.mrb[0].mxu0  ;;  %v297_v63 = vpop.f32.mrb[0].mxu1 }
  0xea   : > { %v298_v0 = vadd.f32 %v297_v63, %v250_v62  ;;  %v728_v1 = vpop.f32.mrb[1].mxu0  ;;  %v734_v3 = vpop.f32.mrb[1].mxu1 }
  0xeb   : > { %v253_v4 = vpop.f32.mrb[2].mxu0  ;;  %v300_v5 = vpop.f32.mrb[2].mxu1 }
  0xec   : > { %v301_v6 = vadd.f32 %v300_v5, %v253_v4  ;;  %v729_v7 = vpop.f32.mrb[3].mxu0  ;;  %v735_v8 = vpop.f32.mrb[3].mxu1 }
  0xf1   : > { %v356_v9 = vpop.f32.mrb[4].mxu0  ;;  %v417_v10 = vpop.f32.mrb[4].mxu1 }
  0xf2   : > { %v363_v2 = vadd.f32 %v356_v9, %v298_v0  ;;  %v740_v11 = vpop.f32.mrb[5].mxu0  ;;  %v746_v12 = vpop.f32.mrb[5].mxu1 }
  0xf3   : > { %v359_v13 = vpop.f32.mrb[6].mxu0  ;;  %v420_v14 = vpop.f32.mrb[6].mxu1 }
  0xf4   : > { %v364_v15 = vadd.f32 %v359_v13, %v301_v6  ;;  %v424_v16 = vadd.f32 %v417_v10, %v363_v2  ;;  %v741_v17 = vpop.f32.mrb[7].mxu0  ;;  %v747_v18 = vpop.f32.mrb[7].mxu1 }
  0xf6   : > { %v425_v19 = vadd.f32 %v420_v14, %v364_v15 }
  0xf9   : > { %v478_v20 = vpop.f32.mrb[8].mxu0  ;;  %v539_v21 = vpop.f32.mrb[8].mxu1 }
  0xfa   : > { %v485_v22 = vadd.f32 %v478_v20, %v424_v16  ;;  %v752_v23 = vpop.f32.mrb[9].mxu0  ;;  %v758_v24 = vpop.f32.mrb[9].mxu1 }
  0xfb   : > { %v481_v25 = vpop.f32.mrb[10].mxu0  ;;  %v542_v26 = vpop.f32.mrb[10].mxu1 }
  0xfc   : > { %v486_v27 = vadd.f32 %v481_v25, %v425_v19  ;;  %v546_v28 = vadd.f32 %v539_v21, %v485_v22  ;;  %v753_v29 = vpop.f32.mrb[11].mxu0  ;;  %v759_v30 = vpop.f32.mrb[11].mxu1 }
  0xfe   : > { %v547_v31 = vadd.f32 %v542_v26, %v486_v27 }
 0x101   : > { %v599_v32 = vpop.f32.mrb[12].mxu0 }
 0x102   : > { %v606_v34 = vadd.f32 %v599_v32, %v546_v28  ;;  %v764_v35 = vpop.f32.mrb[13].mxu0 }
 0x103   : > { %v602_v36 = vpop.f32.mrb[14].mxu0 }
 0x104   : > { %v615_v37 = vadd.f32 %v706_v33, %v606_v34  ;;  %v607_v38 = vadd.f32 %v602_v36, %v547_v31  ;;  %v765_v39 = vpop.f32.mrb[15].mxu0 }
 0x106   : > { %v617_v40 = vmax.f32 %v615_v37, 0.0  ;;  %v616_v41 = vadd.f32 %v706_v33, %v607_v38 }
 0x108   : > { %619 = vst.msk [vmem:[%s184_s5] sm:$0xff] %vm208_vm4, %v617_v40  ;;  %v618_v42 = vmax.f32 %v616_v41, 0.0 }
 0x10a   : > { %620 = vst.msk [vmem:[%s184_s5 + $0x8] sm:$0xff] %vm208_vm4, %v618_v42 }
 0x10b PF: > { %s13_s12 = sadd.s32 1, %s783_s12  }
 0x10c   : > { %p10_p4 = scmp.ge.s32.totalorder %s13_s12, 4  }
 0x10e   :  { %12 = sbr.rel (!%p10_p4) target bundleno = 1 (0x1), region = 71 }

// kernel: stgat_forward.9
= control target key start
LH: loop header
LB: loop body
LE: loop exit
PB: predicated region body
PF: predicated region fallthrough
CT: control target
= control target key end

     0   :  { %v516_v0 = vmov 0.0   ;;  %v518_v1 = vmov 0.0   ;;  %s520_s15 = smov 0   ;;  %s569_s0 = inlined_call_operand.vmem [shape: f32[8,2,12], index: 0, kind: input, shape index: {}]   ;;  %s570_s1 = inlined_call_operand.vmem [shape: bf16[2,12,64], index: 1, kind: input, shape index: {}]   ;;  %s571_s2 = inlined_call_operand.vmem [shape: bf16[2,16,64], index: 2, kind: input, shape index: {}]   ;;  %s572_s3 = inlined_call_operand.vmem [shape: f32[2,1,64], index: 3, kind: input, shape index: {}]   ;;  %s573_s4 = inlined_call_operand.vmem [shape: f32[2,32], index: 4, kind: output, shape index: {}]  }
   0x1 LB: > { %v478_v2 = vmov 0.0   ;;  %v434_v3 = vld [vmem:[%s570_s1] sm:$0x3f]   ;;  %vm97_vm0 = vcmask 1045504   ;;  %v32_v4 = vpack.c.bf16 %v472_v1, %v472_v1  ;;  %vm479_vm1 = vmmov 0   ;;  %s347_s20 = sshll.u32 %s476_s15, 1  ;;  %s476_s15 = sphi %s520_s15, %s23_s15   ;;  %v472_v1 = vphi %v518_v1, %v574_v1   ;;  %v468_v0 = vphi %v516_v0, %v166_v0  }
   0x2   : > { %379 = vmatprep.subr.bf16.mxu1 %v478_v2  ;;  %373 = vmatprep.subr.bf16.mxu0 %v478_v2  ;;  %v435_v5 = vld [vmem:[%s571_s2] sm:$0xff]   ;;  %v99_v6 = vsel %vm97_vm0, %v434_v3, 0  ;;  %s27_s23 = scalar_lea.vmem %s569_s0, %s347_s20  ;;  %s480_s24 = smov 80   ;;  %vm93_vm2 = vcmask 97280   ;;  %vm44_vm3 = vcmask 130048  }
   0x3   : > { %381 = vmatprep.mubr.msk.bf16.mxu1 %vm479_vm1, %v478_v2  ;;  %375 = vmatprep.mubr.msk.bf16.mxu0 %vm479_vm1, %v478_v2  ;;  %v28_v7 = vld [vmem:[%s27_s23] sm:$0x3]  ;;  %s481_s27 = smov 96   ;;  %s482_s28 = smov 16  }
   0x4   : > { %36 = vrot.lane.b32.xlu0 %v32_v4, %s480_s24  ;;  %380 = vmatpush3.bf16.msra.mxu1 %v99_v6  ;;  %v29_v8 = vpack.c.bf16 %v28_v7, %v28_v7  ;;  %v352_v15 = vld [vmem:[%s572_s3] ss:$0 sm:$0xff]  ;;  %s483_s29 = smov 32   ;;  %s23_s15 = sadd.s32 1, %s476_s15  }
   0x5   : > { %374 = vmatpush3.bf16.msra.mxu0 %v435_v5  ;;  %p20_p0 = scmp.ge.s32.totalorder %s23_s15, 8  }
   0x6   :  { %v444_v33 = vld [vmem:[%s571_s2 + $0x8] sm:$0xff] (%p20_p0)   ;;  %v484_v34 = vmov (%p20_p0), 0.0   ;;  %vm485_vm4 = vmmov (%p20_p0), 0   ;;  %v486_v39 = vmov (%p20_p0), 0   ;;  %v363_v43 = vld [vmem:[%s572_s3 + $0x1] ss:$0 sm:$0xff] (%p20_p0) }
   0x7   : > { %382 = vmatmul.mubr.msk.bf16.vlgmr.msra.gmra.mrb[0].mxu1 %vm93_vm2, %v29_v8  ;;  %385 = vmatprep.subr.bf16.mxu0 (%p20_p0), %v484_v34  ;;  %v445_v35 = vld [vmem:[%s570_s1 + $0x8] sm:$0x3f] (%p20_p0)   ;;  %v354_v36 = vld [vmem:[%s569_s0 + $0xe] sm:$0x3] (%p20_p0)  ;;  %s487_s0 = smov (%p20_p0), 96   ;;  %s488_s3 = smov (%p20_p0), 16  }
   0x8   :  { %391 = vmatprep.subr.bf16.mxu1 (%p20_p0), %v484_v34  ;;  %v243_v37 = vsel (%p20_p0), %vm97_vm0, %v445_v35, 0  ;;  %393 = vmatprep.mubr.msk.bf16.mxu1 (%p20_p0), %vm485_vm4, %v484_v34  ;;  %v175_v38 = vpack.c.bf16 (%p20_p0), %v354_v36, %v354_v36  ;;  %s489_s10 = smov (%p20_p0), 32   ;;  %s490_s11 = smov (%p20_p0), 80   ;;  %vm322_vm5 = vcmask (%p20_p0), 123904   ;;  %vm328_vm6 = vcmask (%p20_p0), 255104  }
   0x9   :  { %392 = vmatpush3.bf16.msra.mxu1 (%p20_p0), %v243_v37 }
  0x76   : > { %v37_v9 = vpop.permute.xlu0 %36 }
  0x77   : > { %376 = vmatmul.mubr.msk.bf16.vlgmr.msra.gmra.mrb[0].mxu0 %vm44_vm3, %v37_v9 }
  0x78   :  { %386 = vmatpush3.bf16.msra.mxu0 (%p20_p0), %v444_v33  ;;  %387 = vmatprep.mubr.msk.bf16.mxu0 (%p20_p0), %vm485_vm4, %v484_v34 }
  0xda   : > { %v135_v10 = vpop.f32.mrb[0].mxu1 }
  0xdb   : > { %v383_v11 = vpop.f32.mrb[1].mxu1 }
  0xdc   : > { %v138_v12 = vpop.f32.mrb[2].mxu1 }
  0xdd   : > { %v384_v13 = vpop.f32.mrb[3].mxu1  ;;  %394 = vmatmul.mubr.msk.bf16.vlgmr.msra.gmra.mrb[0].mxu1 (%p20_p0), %vm93_vm2, %v175_v38 }
 0x14a   : > { %v82_v14 = vpop.f32.mrb[0].mxu0 }
 0x14b   : > { %v136_v16 = vadd.f32 %v135_v10, %v82_v14  ;;  %v377_v17 = vpop.f32.mrb[1].mxu0 }
 0x14c   : > { %v85_v18 = vpop.f32.mrb[2].mxu0 }
 0x14d   : > { %v148_v19 = vadd.f32 %v352_v15, %v136_v16  ;;  %v378_v20 = vpop.f32.mrb[3].mxu0  ;;  %388 = vmatmul.mubr.bf16.vlgmr.msra.gmra.mrb[0].mxu0 (%p20_p0), %v486_v39 }
 0x14f   : > { %436 = vtanh.f32 %v148_v19  ;;  %v353_v22 = vmul.f32 -1.442695, %v148_v19 }
 0x151   : > { %438 = vpow2.f32 %v353_v22 }
 0x159   : > { %v437_v21 = vpop.eup %436 }
 0x15a   : > { %158 = vrot.lane.b32.xlu0 %v437_v21, %s481_s27 }
 0x15b   : > { %v439_v23 = vpop.eup %438 }
 0x15c   : > { %v152_v24 = vadd.f32 1.0, %v439_v23 }
 0x15e   : > { %440 = vrcp.f32 %v152_v24 }
 0x168   : > { %v441_v25 = vpop.eup %440 }
 0x169   : > { %v156_v28 = vmul.f32 %v468_v0, %v441_v25 }
 0x1b0   :  { %v279_v42 = vpop.f32.mrb[0].mxu1 (%p20_p0) }
 0x1b1   :  { %v395_v46 = vpop.f32.mrb[1].mxu1 (%p20_p0) }
 0x1b2   :  { %v282_v48 = vpop.f32.mrb[2].mxu1 (%p20_p0) }
 0x1b3   :  { %v396_v50 = vpop.f32.mrb[3].mxu1 (%p20_p0) }
 0x1cc   : > { %v159_v26 = vpop.permute.xlu0 %158 }
 0x1cd   : > { %v161_v27 = vmul.f32 %v441_v25, %v159_v26 }
 0x1cf   : > { %163 = vrot.lane.b32.xlu1 %v161_v27, %s482_s28 }
 0x220   :  { %v226_v40 = vpop.f32.mrb[0].mxu0 (%p20_p0) }
 0x221   :  { %v389_v41 = vpop.f32.mrb[1].mxu0 (%p20_p0)  ;;  %v280_v45 = vadd.f32 (%p20_p0), %v279_v42, %v226_v40 }
 0x222   :  { %v229_v44 = vpop.f32.mrb[2].mxu0 (%p20_p0) }
 0x223   :  { %v390_v47 = vpop.f32.mrb[3].mxu0 (%p20_p0)  ;;  %v293_v49 = vadd.f32 (%p20_p0), %v363_v43, %v280_v45 }
 0x225   :  { %v364_v52 = vmul.f32 (%p20_p0), -1.442695, %v293_v49 }
 0x241   : > { %v164_v29 = vpop.permute.xlu1 %163 }
 0x242   : > { %v166_v0 = vadd.f32 %v164_v29, %v156_v28  }
 0x244   : > { %442 = vtanh.f32 %v166_v0 }
 0x245   :  { %446 = vtanh.f32 (%p20_p0), %v293_v49 }
 0x246   :  { %448 = vpow2.f32 (%p20_p0), %v364_v52 }
 0x24e   : > { %v443_v30 = vpop.eup %442 }
 0x24f   : > { %169 = vrot.lane.b32.xlu1 %v443_v30, %s483_s29  ;;  %v447_v51 = vpop.eup (%p20_p0), %446 }
 0x250   :  { %303 = vrot.lane.b32.xlu0 (%p20_p0), %v447_v51, %s487_s0  ;;  %v449_v53 = vpop.eup (%p20_p0), %448 }
 0x251   :  { %v297_v54 = vadd.f32 (%p20_p0), 1.0, %v449_v53 }
 0x253   :  { %450 = vrcp.f32 (%p20_p0), %v297_v54 }
 0x25d   :  { %v451_v55 = vpop.eup (%p20_p0), %450 }
 0x25e   :  { %v301_v58 = vmul.f32 (%p20_p0), 0.0, %v451_v55 }
 0x2be   :  { %22 = sbr.rel (!%p20_p0) target bundleno = 1 (0x1), region = 48 }
 0x2c1   : > { %v170_v31 = vpop.permute.xlu1 %169 }
 0x2c2   : > { %v172_v32 = vmul.f32 %v441_v25, %v170_v31   ;;  %v304_v56 = vpop.permute.xlu0 (%p20_p0), %303 }
 0x2c3   :  { %v306_v57 = vmul.f32 (%p20_p0), %v451_v55, %v304_v56 }
 0x2c4   : > { %v574_v1 = vmov %v172_v32 }
 0x2c5   :  { %308 = vrot.lane.b32.xlu0 %v306_v57, %s488_s3 }
 0x337   :  { %v309_v59 = vpop.permute.xlu0 %308 }
 0x338   :  { %v311_v60 = vadd.f32 %v309_v59, %v301_v58 }
 0x33a   :  { %452 = vtanh.f32 %v311_v60 }
 0x344   :  { %v453_v61 = vpop.eup %452 }
 0x345   :  { %314 = vrot.lane.b32.xlu1 %v453_v61, %s489_s10 }
 0x349   :  { %319 = vrot.lane.b32.xlu1 %v172_v32, %s490_s11 }
 0x3b7   :  { %v315_v62 = vpop.permute.xlu1 %314 }
 0x3b8   :  { %v317_v63 = vmul.f32 %v451_v55, %v315_v62 }
 0x3ba   :  { %325 = vrot.lane.b32.xlu0 %v317_v63, %s487_s0 }
 0x3bb   :  { %v320_v0 = vpop.permute.xlu1 %319 }
 0x3bc   :  { %323 = vst.msk [vmem:[%s573_s4] sm:$0x3] %vm322_vm5, %v320_v0 }
 0x42c   :  { %v326_v1 = vpop.permute.xlu0 %325 }
 0x42d   :  { %329 = vst.msk [vmem:[%s573_s4] sm:$0x3] %vm328_vm6, %v326_v1 }

// kernel: stgat_forward.7
= control target key start
LH: loop header
LB: loop body
LE: loop exit
PB: predicated region body
PF: predicated region fallthrough
CT: control target
= control target key end

     0   :  { %s1201_s30 = smov 0   ;;  %s1318_s0 = inlined_call_operand.vmem [shape: f32[3,2,4,8], index: 0, kind: input, shape index: {}]   ;;  %s1319_s1 = inlined_call_operand.vmem [shape: bf16[3,8,8], index: 1, kind: input, shape index: {}]   ;;  %s1320_s2 = inlined_call_operand.vmem [shape: f32[3,1,8], index: 2, kind: input, shape index: {}]   ;;  %s1321_s3 = inlined_call_operand.vmem [shape: f32[3,1,8], index: 3, kind: input, shape index: {}]   ;;  %s1322_s4 = inlined_call_operand.vmem [shape: f32[3,1,8], index: 4, kind: input, shape index: {}]   ;;  %s1323_s5 = inlined_call_operand.vmem [shape: f32[4,4], index: 5, kind: input, shape index: {}]   ;;  %s1324_s6 = inlined_call_operand.vmem [shape: bf16[3,4,4], index: 6, kind: input, shape index: {}]   ;;  %s1325_s7 = inlined_call_operand.vmem [shape: f32[3,4,1], index: 7, kind: input, shape index: {}]   ;;  %s1326_s8 = inlined_call_operand.vmem [shape: bf16[8,8], index: 8, kind: input, shape index: {}]   ;;  %s1327_s9 = inlined_call_operand.vmem [shape: f32[3,2,4,8], index: 9, kind: output, shape index: {}]  }
   0x1 LB: > { %s1029_s10 = sadd.s32 4294967295, %s1146_s30   ;;  %p1033_p0 = scmp.ge.s32.totalorder %s1146_s30, 1  ;;  %s1146_s30 = sphi %s1201_s30, %s19_s30  }
   0x2   : > { %p338_p1 = scmp.lt.s32.totalorder %s1146_s30, 4 }
   0x4   : > { %p339_p2 = pnand %p1033_p0, %p338_p1 }
   0x5   : > { %p395_p3 = scmp.lt.s32.totalorder (!%p339_p2), %s1029_s10, 2  ;;  %v1148_v0 = vmov (!%p339_p2), 0.0   ;;  %vm1149_vm0 = vmmov (!%p339_p2), 0   ;;  %vm436_vm1 = vcmask (!%p339_p2), 1043456   ;;  %vm432_vm2 = vcmask (!%p339_p2), 64512  }
   0x6   : > { %342 = sbr.rel (%p339_p2) target bundleno = 1360 (0x550), region = 56  ;;  %1072 = vmatprep.subr.bf16.mxu0 (!%p339_p2), %v1148_v0  ;;  %1078 = vmatprep.subr.bf16.mxu1 (!%p339_p2), %v1148_v0  ;;  %vm532_vm3 = vcmask (!%p339_p2), 60416   ;;  %vm623_vm4 = vcmask (!%p339_p2), 1041408   ;;  %v556_v29 = vlaneseq (!%p339_p2)  ;;  %v582_v40 = vld [vmem:[%s1323_s5] sm:$0xf] (!%p339_p2)  ;;  %vm585_vm6 = vcmask (!%p339_p2), 27648  }
   0x7   : > { %1074 = vmatprep.mubr.msk.bf16.mxu0 (!%p339_p2), %vm1149_vm0, %v1148_v0  ;;  %1080 = vmatprep.mubr.msk.bf16.mxu1 (!%p339_p2), %vm1149_vm0, %v1148_v0  ;;  %vm619_vm8 = vcmask (!%p339_p2), 31744  }
   0x8   : > { %v557_v30 = vand.u32 (!%p339_p2), 127, %v556_v29  ;;  %v559_v31 = vshrl.u32 (!%p339_p2), %v556_v29, 7 }
   0xa   : > { %v560_v33 = vsub.s32 (!%p339_p2), %v557_v30, %v559_v31 }
   0xd   : > { %s1329_s10 = smov (!%p395_p3, %s1029_s10), 2 }
   0xe   : > { %s1036_s11 = sshll.u32 %s1329_s10, 2  ;;  %s1054_s12 = sshll.u32 %s1329_s10, 3 }
   0xf   : > { %s403_s15 = scalar_lea.vmem %s1319_s1, %s1036_s11  ;;  %s399_s18 = scalar_lea.vmem %s1318_s0, %s1054_s12 }
  0x10   : > { %v429_v1 = vld [vmem:[%s403_s15] sm:$0xf]  ;;  %v1231_v3 = vld [vmem:[%s399_s18 + $0x4] sm:$0xf]  ;;  %s406_s21 = scalar_lea.vmem %s1320_s2, %s1329_s10  ;;  %s409_s24 = scalar_lea.vmem %s1321_s3, %s1329_s10 }
  0x11   : > { %v1229_v2 = vld [vmem:[%s399_s18] sm:$0xf]  ;;  %v438_v4 = vsel %vm436_vm1, %v429_v1, 0  ;;  %v431_v6 = vpack.c.bf16 %v1231_v3, %v1231_v3  ;;  %s412_s29 = scalar_lea.vmem %s1322_s4, %s1329_s10  ;;  %s1037_s13 = sshll.u32 %s1329_s10, 1 }
  0x12   : > { %v430_v5 = vpack.c.bf16 %v1229_v2, %v1229_v2  ;;  %1073 = vmatpush3.bf16.msra.mxu0 %v438_v4  ;;  %1079 = vmatpush3.bf16.msra.mxu1 %v438_v4  ;;  %v1044_v7 = vld [vmem:[%s406_s21] ss:$0 sm:$0xff]  ;;  %s416_s16 = scalar_lea.vmem %s1324_s6, %s1037_s13  ;;  %s420_s21 = scalar_lea.vmem %s1325_s7, %s1036_s11 }
  0x13   : > { %1084 = vmatprep.subr.bf16.mxu0 %v1148_v0  ;;  %1090 = vmatprep.subr.bf16.mxu1 %v1148_v0  ;;  %v546_v8 = vmul.f32 %v1044_v7, %v1229_v2  ;;  %v547_v10 = vmul.f32 %v1044_v7, %v1231_v3  ;;  %v1043_v12 = vld [vmem:[%s409_s24] ss:$0 sm:$0xff]  ;;  %s425_s23 = scalar_lea.vmem %s1327_s9, %s1054_s12 }
  0x14   : > { %v1045_v7 = vld [vmem:[%s412_s29] ss:$0 sm:$0xff] }
  0x15   : > { %1075 = vmatmul.mubr.msk.bf16.vlgmr.msra.gmra.mrb[0].mxu0 %vm432_vm2, %v430_v5  ;;  %1081 = vmatmul.mubr.msk.bf16.vlgmr.msra.gmra.mrb[0].mxu1 %vm432_vm2, %v431_v6  ;;  %v548_v9 = vsel %vm532_vm3, %v546_v8, 0.0  ;;  %v551_v11 = vsel %vm532_vm3, %v547_v10, 0.0 }
  0x16   : > { %1086 = vmatprep.mubr.msk.bf16.mxu0 %vm1149_vm0, %v1148_v0  ;;  %1092 = vmatprep.mubr.msk.bf16.mxu1 %vm1149_vm0, %v1148_v0 }
  0x17   : > { %549 = vadd.xlane.f32.xlu0 %v548_v9 }
  0x1b   : > { %552 = vadd.xlane.f32.xlu0 %v551_v11 }
  0xa4   : > { %v550_v32 = vpop.xlane.xlu0 %549 }
  0xa5   : > { %v561_v34 = vrot.slane %v550_v32, %v560_v33 }
  0xa8   : > { %v553_v35 = vpop.xlane.xlu0 %552 }
  0xa9   : > { %v565_v38 = vrot.slane %v553_v35, %v560_v33 }
  0xe8   : > { %v474_v13 = vpop.f32.mrb[0].mxu0  ;;  %v517_v14 = vpop.f32.mrb[0].mxu1 }
  0xe9   : > { %v610_v15 = vpack.c.bf16 %v474_v13, %v474_v13  ;;  %v1076_v16 = vpop.f32.mrb[1].mxu0  ;;  %v531_v17 = vmul.f32 %v1043_v12, %v517_v14  ;;  %v611_v18 = vpack.c.bf16 %v517_v14, %v517_v14  ;;  %v1082_v19 = vpop.f32.mrb[1].mxu1  ;;  %v530_v20 = vmul.f32 %v1043_v12, %v474_v13 }
  0xea   : > { %v477_v21 = vpop.f32.mrb[2].mxu0  ;;  %v520_v22 = vpop.f32.mrb[2].mxu1 }
  0xeb   : > { %v1077_v23 = vpop.f32.mrb[3].mxu0  ;;  %v1083_v24 = vpop.f32.mrb[3].mxu1  ;;  %v625_v25 = vsel %vm623_vm4, %v610_v15, 0  ;;  %v533_v26 = vsel %vm532_vm3, %v530_v20, 0.0  ;;  %v671_v27 = vsel %vm623_vm4, %v611_v18, 0  ;;  %v536_v28 = vsel %vm532_vm3, %v531_v17, 0.0 }
  0xec   : > { %1085 = vmatpush3.bf16.msra.mxu0 %v625_v25  ;;  %534 = vadd.xlane.f32.xlu1 %v533_v26  ;;  %v807_v18 = vld [vmem:[%s1326_s8] sm:$0xf] }
  0xed   : > { %1091 = vmatpush3.bf16.msra.mxu1 %v671_v27  ;;  %1096 = vmatprep.subr.bf16.mxu0 %v1148_v0  ;;  %v715_v23 = vld [vmem:[%s416_s16] sm:$0x3]  ;;  %v820_v24 = vsel %vm436_vm1, %v807_v18, 0  ;;  %v1150_v27 = vmov 0  }
  0xee   : > { %1102 = vmatprep.subr.bf16.mxu1 %v1148_v0  ;;  %1131 = vset.pattern.permute.xlu0 %v1150_v27 }
  0xf0   : > { %537 = vadd.xlane.f32.xlu1 %v536_v28  ;;  %v810_v28 = vld [vmem:[%s420_s21] sm:$0xf] }
 0x179   : > { %v535_v36 = vpop.xlane.xlu1 %534 }
 0x17a   : > { %v574_v37 = vadd.f32 %v561_v34, %v535_v36 }
 0x17c   : > { %vm576_vm5 = vcmp.ge.f32.partialorder %v574_v37, 0.0  ;;  %v578_v39 = vmul.f32 0.2, %v574_v37 }
 0x17d   : > { %v538_v41 = vpop.xlane.xlu1 %537 }
 0x17e   : > { %v575_v42 = vadd.f32 %v565_v38, %v538_v41  ;;  %v580_v43 = vsel %vm576_vm5, %v574_v37, %v578_v39 }
 0x17f   : > { %v583_v44 = vadd.f32 %v582_v40, %v580_v43 }
 0x180   : > { %vm577_vm7 = vcmp.ge.f32.partialorder %v575_v42, 0.0  ;;  %v579_v45 = vmul.f32 0.2, %v575_v42 }
 0x181   : > { %v586_v46 = vsel %vm585_vm6, %v583_v44, -inf }
 0x182   : > { %587 = vmax.xlane.f32.xlu0 %v586_v46  ;;  %v581_v47 = vsel %vm577_vm7, %v575_v42, %v579_v45 }
 0x183   : > { %v584_v48 = vadd.f32 %v582_v40, %v581_v47 }
 0x185   : > { %v589_v49 = vsel %vm585_vm6, %v584_v48, -inf }
 0x186   : > { %590 = vmax.xlane.f32.xlu1 %v589_v49 }
 0x20f   : > { %v588_v50 = vpop.xlane.xlu0 %587 }
 0x210   : > { %v592_v51 = vsub.f32 %v583_v44, %v588_v50 }
 0x212   : > { %v594_v52 = vmul.f32 1.442695, %v592_v51 }
 0x213   : > { %v591_v53 = vpop.xlane.xlu1 %590 }
 0x214   : > { %1132 = vpow2.f32 %v594_v52  ;;  %v593_v54 = vsub.f32 %v584_v48, %v591_v53 }
 0x216   : > { %v596_v55 = vmul.f32 1.442695, %v593_v54 }
 0x218   : > { %1134 = vpow2.f32 %v596_v55 }
 0x21e   : > { %v1133_v56 = vpop.eup %1132 }
 0x21f   : > { %v598_v57 = vsel %vm585_vm6, %v1133_v56, 0.0 }
 0x220   : > { %599 = vadd.xlane.f32.xlu0 %v598_v57 }
 0x222   : > { %v1135_v58 = vpop.eup %1134 }
 0x223   : > { %v601_v59 = vsel %vm585_vm6, %v1135_v58, 0.0 }
 0x224   : > { %602 = vadd.xlane.f32.xlu1 %v601_v59 }
 0x236   : > { %813 = vperm.xlu0 %1131, %v810_v28  }
 0x2ad   : > { %v600_v60 = vpop.xlane.xlu0 %599 }
 0x2ae   : > { %1136 = vrcp.f32 %v600_v60 }
 0x2b1   : > { %v603_v61 = vpop.xlane.xlu1 %602 }
 0x2b2   : > { %1138 = vrcp.f32 %v603_v61 }
 0x2b5   : > { %v814_v38 = vpop.permute.xlu0 %813 }
 0x2b8   : > { %v1137_v62 = vpop.eup %1136 }
 0x2b9   : > { %v605_v63 = vmul.f32 %v1137_v62, %v1133_v56 }
 0x2bb   : > { %v608_v1 = vpack.c.bf16 %v605_v63, %v605_v63 }
 0x2bc   : > { %v1139_v4 = vpop.eup %1138 }
 0x2bd   : > { %v607_v5 = vmul.f32 %v1139_v4, %v1135_v58  ;;  %1087 = vmatmul.mubr.msk.bf16.vlgmr.msra.gmra.mrb[4].mxu0 %vm619_vm8, %v608_v1 }
 0x2be   : > { %1098 = vmatprep.mubr.msk.bf16.mxu0 %vm1149_vm0, %v1148_v0 }
 0x2bf   : > { %v609_v6 = vpack.c.bf16 %v607_v5, %v607_v5 }
 0x2c1   : > { %1093 = vmatmul.mubr.msk.bf16.vlgmr.msra.gmra.mrb[4].mxu1 %vm619_vm8, %v609_v6 }
 0x2c2   : > { %1104 = vmatprep.mubr.msk.bf16.mxu1 %vm1149_vm0, %v1148_v0 }
 0x390   : > { %v661_v8 = vpop.f32.mrb[4].mxu0 }
 0x391   : > { %v662_v9 = vadd.f32 %v1045_v7, %v661_v8  ;;  %v1088_v10 = vpop.f32.mrb[5].mxu0 }
 0x392   : > { %v664_v11 = vpop.f32.mrb[6].mxu0 }
 0x393   : > { %v713_v12 = vmax.f32 %v662_v9, 0.0  ;;  %v1089_v13 = vpop.f32.mrb[7].mxu0 }
 0x394   : > { %v707_v14 = vpop.f32.mrb[4].mxu1 }
 0x395   : > { %v716_v15 = vpack.c.bf16 %v713_v12, %v713_v12  ;;  %v708_v16 = vadd.f32 %v1045_v7, %v707_v14  ;;  %v1094_v17 = vpop.f32.mrb[5].mxu1 }
 0x396   : > { %v710_v19 = vpop.f32.mrb[6].mxu1 }
 0x397   : > { %v714_v20 = vmax.f32 %v708_v16, 0.0  ;;  %v1095_v21 = vpop.f32.mrb[7].mxu1  ;;  %v722_v22 = vsel %vm623_vm4, %v716_v15, 0 }
 0x398   : > { %1097 = vmatpush3.bf16.msra.mxu0 %v722_v22 }
 0x399   : > { %v717_v25 = vpack.c.bf16 %v714_v20, %v714_v20  ;;  %1108 = vmatprep.subr.bf16.mxu0 %v1148_v0 }
 0x39b   : > { %v765_v26 = vsel %vm623_vm4, %v717_v25, 0  ;;  %1099 = vmatmul.mubr.msk.bf16.vlgmr.msra.gmra.mrb[8].mxu0 %vm619_vm8, %v715_v23 }
 0x39c   : > { %1103 = vmatpush3.bf16.msra.mxu1 %v765_v26  ;;  %1109 = vmatpush3.bf16.msra.mxu0 %v820_v24 }
 0x39d   : > { %1114 = vmatprep.subr.bf16.mxu1 %v1148_v0  ;;  %1110 = vmatprep.mubr.msk.bf16.mxu0 %vm1149_vm0, %v1148_v0 }
 0x39f   : > { %1105 = vmatmul.mubr.msk.bf16.vlgmr.msra.gmra.mrb[8].mxu1 %vm619_vm8, %v715_v23 }
 0x3a0   : > { %1115 = vmatpush3.bf16.msra.mxu1 %v820_v24  ;;  %1116 = vmatprep.mubr.msk.bf16.mxu1 %vm1149_vm0, %v1148_v0 }
 0x46e   : > { %v758_v29 = vpop.f32.mrb[8].mxu0 }
 0x46f   : > { %v808_v30 = vpack.c.bf16 %v758_v29, %v758_v29  ;;  %v1100_v31 = vpop.f32.mrb[9].mxu0 }
 0x470   : > { %v761_v32 = vpop.f32.mrb[10].mxu0 }
 0x471   : > { %v1101_v33 = vpop.f32.mrb[11].mxu0  ;;  %1111 = vmatmul.mubr.msk.bf16.vlgmr.msra.gmra.mrb[12].mxu0 %vm432_vm2, %v808_v30 }
 0x472   : > { %v801_v34 = vpop.f32.mrb[8].mxu1 }
 0x473   : > { %v809_v35 = vpack.c.bf16 %v801_v34, %v801_v34  ;;  %v1106_v0 = vpop.f32.mrb[9].mxu1 }
 0x474   : > { %v804_v36 = vpop.f32.mrb[10].mxu1 }
 0x475   : > { %v1107_v37 = vpop.f32.mrb[11].mxu1  ;;  %1117 = vmatmul.mubr.msk.bf16.vlgmr.msra.gmra.mrb[12].mxu1 %vm432_vm2, %v809_v35 }
 0x544   : > { %v856_v39 = vpop.f32.mrb[12].mxu0 }
 0x545   : > { %v1112_v40 = vpop.f32.mrb[13].mxu0  ;;  %v857_v41 = vadd.f32 %v856_v39, %v814_v38 }
 0x546   : > { %v859_v42 = vpop.f32.mrb[14].mxu0 }
 0x547   : > { %v905_v43 = vmax.f32 %v857_v41, 0.0  ;;  %v1113_v44 = vpop.f32.mrb[15].mxu0 }
 0x548   : > { %v899_v45 = vpop.f32.mrb[12].mxu1 }
 0x549   : > { %v1118_v46 = vpop.f32.mrb[13].mxu1  ;;  %v900_v47 = vadd.f32 %v899_v45, %v814_v38  ;;  %v907_v48 = vadd.f32 %v905_v43, %v1229_v2 }
 0x54a   : > { %v902_v49 = vpop.f32.mrb[14].mxu1 }
 0x54b   : > { %v906_v50 = vmax.f32 %v900_v47, 0.0  ;;  %909 = vst.msk [vmem:[%s425_s23] sm:$0xf] %vm532_vm3, %v907_v48  ;;  %v1119_v51 = vpop.f32.mrb[15].mxu1 }
 0x54d   : > { %v908_v52 = vadd.f32 %v906_v50, %v1231_v3 }
 0x54f   : > { %910 = vst.msk [vmem:[%s425_s23 + $0x4] sm:$0xf] %vm532_vm3, %v908_v52 }
 0x550 PF: > { %s19_s30 = sadd.s32 1, %s1146_s30  }
 0x551   : > { %p16_p4 = scmp.ge.s32.totalorder %s19_s30, 5  }
 0x553   :  { %18 = sbr.rel (!%p16_p4) target bundleno = 1 (0x1), region = 104 }

// kernel: stgat_forward.10
= control target key start
LH: loop header
LB: loop body
LE: loop exit
PB: predicated region body
PF: predicated region fallthrough
CT: control target
= control target key end

     0   :  { %v406_v0 = vmov 0.0   ;;  %s408_s24 = smov 0   ;;  %s464_s0 = inlined_call_operand.vmem [shape: f32[8,2,32], index: 0, kind: input, shape index: {}]   ;;  %s465_s1 = inlined_call_operand.vmem [shape: bf16[32,48], index: 1, kind: input, shape index: {}]   ;;  %s466_s2 = inlined_call_operand.vmem [shape: bf16[16,48], index: 2, kind: input, shape index: {}]   ;;  %s467_s3 = inlined_call_operand.vmem [shape: f32[1,48], index: 3, kind: input, shape index: {}]   ;;  %s468_s4 = inlined_call_operand.vmem [shape: f32[1,48], index: 4, kind: input, shape index: {}]   ;;  %s469_s5 = inlined_call_operand.vmem [shape: bf16[16,4], index: 5, kind: input, shape index: {}]   ;;  %s470_s6 = inlined_call_operand.vmem [shape: f32[1,4], index: 6, kind: input, shape index: {}]   ;;  %s471_s7 = inlined_call_operand.vmem [shape: f32[8,2,4], index: 7, kind: output, shape index: {}]  }
   0x1 LB: > { %v361_v1 = vmov 0.0   ;;  %v335_v2 = vld [vmem:[%s465_s1] sm:$0xff]   ;;  %v105_v3 = vpack.c.bf16 %v355_v0, %v355_v0  ;;  %vm362_vm0 = vmmov 0   ;;  %s275_s27 = sshll.u32 %s359_s24, 1  ;;  %v336_v4 = vld [vmem:[%s465_s1 + $0x8] sm:$0xff]   ;;  %s363_s12 = smov 112   ;;  %s359_s24 = sphi %s408_s24, %s32_s24   ;;  %v355_v0 = vphi %v406_v0, %v193_v0  }
   0x2   : > { %294 = vmatprep.subr.bf16.mxu0 %v361_v1  ;;  %302 = vmatprep.subr.bf16.mxu1 %v361_v1  ;;  %v337_v5 = vld [vmem:[%s466_s2] sm:$0xff]   ;;  %s35_s11 = scalar_lea.vmem %s464_s0, %s275_s27  ;;  %vm61_vm1 = vcmask 261120   ;;  %vm124_vm2 = vcmask 130048   ;;  %s364_s15 = smov 96   ;;  %vm257_vm3 = vcmask 25600  }
   0x3   : > { %298 = vmatprep.mubr.msk.bf16.mxu0 %vm362_vm0, %v361_v1  ;;  %304 = vmatprep.mubr.msk.bf16.mxu1 %vm362_vm0, %v361_v1  ;;  %v36_v6 = vld [vmem:[%s35_s11] sm:$0x3]  ;;  %s365_s18 = smov 32   ;;  %s256_s26 = scalar_lea.vmem %s471_s7, %s275_s27 }
   0x4   : > { %295 = vmatpush3.bf16.msra.mxu0 %v335_v2  ;;  %116 = vrot.lane.b32.xlu0 %v105_v3, %s363_s12  ;;  %v37_v7 = vpack.c.bf16 %v36_v6, %v36_v6  ;;  %v280_v13 = vld [vmem:[%s468_s4] ss:$0 sm:$0xff]  ;;  %s32_s24 = sadd.s32 1, %s359_s24  }
   0x5   : > { %296 = vmatprep.subr.bf16.mxu0 %v361_v1  ;;  %303 = vmatpush3.bf16.msra.mxu1 %v337_v5  ;;  %v276_v19 = vld [vmem:[%s467_s3] ss:$0 sm:$0xff]  ;;  %p29_p0 = scmp.ge.s32.totalorder %s32_s24, 8  }
   0x6   : > { %308 = vmatprep.subr.bf16.mxu1 %v361_v1  ;;  %v338_v30 = vld [vmem:[%s469_s5] sm:$0xff]  }
   0x7   : > { %v284_v38 = vld [vmem:[%s470_s6] ss:$0 sm:$0xff] }
   0x8   : > { %297 = vmatpush3.bf16.msra.mxu0 %v336_v4 }
   0xb   : > { %299 = vmatmul.mubr.msk.bf16.vlgmr.msra.gmra.mrb[0].mxu0 %vm61_vm1, %v37_v7 }
  0x76   : > { %v117_v8 = vpop.permute.xlu0 %116 }
  0x77   : > { %305 = vmatmul.mubr.msk.bf16.vlgmr.msra.gmra.mrb[0].mxu1 %vm124_vm2, %v117_v8 }
  0x78   : > { %310 = vmatprep.mubr.msk.bf16.mxu1 %vm362_vm0, %v361_v1  ;;  %309 = vmatpush3.bf16.msra.mxu1 %v338_v30 }
  0xde   : > { %v99_v9 = vpop.f32.mrb[0].mxu0 }
  0xdf   : > { %v300_v10 = vpop.f32.mrb[1].mxu0  ;;  %v100_v20 = vadd.f32 %v276_v19, %v99_v9 }
  0xe0   : > { %v102_v11 = vpop.f32.mrb[2].mxu0 }
  0xe1   : > { %v301_v12 = vpop.f32.mrb[3].mxu0 }
 0x14a   : > { %v162_v14 = vpop.f32.mrb[0].mxu1 }
 0x14b   : > { %v163_v15 = vadd.f32 %v280_v13, %v162_v14  ;;  %v306_v16 = vpop.f32.mrb[1].mxu1 }
 0x14c   : > { %v165_v17 = vpop.f32.mrb[2].mxu1 }
 0x14d   : > { %176 = vrot.lane.b32.xlu0 %v163_v15, %s364_s15  ;;  %v307_v18 = vpop.f32.mrb[3].mxu1  ;;  %v168_v21 = vadd.f32 %v163_v15, %v100_v20 }
 0x14f   : > { %v283_v22 = vmul.f32 -1.442695, %v168_v21 }
 0x151   : > { %339 = vpow2.f32 %v283_v22 }
 0x15b   : > { %v340_v23 = vpop.eup %339 }
 0x15c   : > { %v172_v24 = vadd.f32 1.0, %v340_v23 }
 0x15e   : > { %341 = vrcp.f32 %v172_v24 }
 0x168   : > { %v342_v25 = vpop.eup %341 }
 0x169   : > { %v186_v32 = vsub.f32 1.0, %v342_v25  ;;  %v192_v34 = vmul.f32 %v355_v0, %v342_v25 }
 0x1bf   : > { %v177_v26 = vpop.permute.xlu0 %176 }
 0x1c0   : > { %v179_v27 = vmul.f32 %v342_v25, %v177_v26 }
 0x1c2   : > { %181 = vrot.lane.b32.xlu1 %v179_v27, %s365_s18 }
 0x234   : > { %v182_v28 = vpop.permute.xlu1 %181 }
 0x235   : > { %v184_v29 = vadd.f32 %v182_v28, %v100_v20 }
 0x237   : > { %343 = vtanh.f32 %v184_v29 }
 0x241   : > { %v344_v31 = vpop.eup %343 }
 0x242   : > { %188 = vrot.lane.b32.xlu1 %v344_v31, %s363_s12 }
 0x2b4   : > { %v189_v33 = vpop.permute.xlu1 %188 }
 0x2b5   : > { %v191_v35 = vmul.f32 %v189_v33, %v186_v32 }
 0x2b7   : > { %v193_v0 = vadd.f32 %v192_v34, %v191_v35  }
 0x2b9   : > { %v194_v36 = vpack.c.bf16 %v193_v0, %v193_v0 }
 0x2bb   : > { %205 = vrot.lane.b32.xlu0 %v194_v36, %s363_s12 }
 0x32d   : > { %v206_v37 = vpop.permute.xlu0 %205 }
 0x32e   : > { %311 = vmatmul.mubr.msk.bf16.vlgmr.msra.gmra.mrb[4].mxu1 %vm124_vm2, %v206_v37 }
 0x3fe   :  { %31 = sbr.rel (!%p29_p0) target bundleno = 1 (0x1), region = 57 }
 0x401   : > { %v250_v39 = vpop.f32.mrb[4].mxu1 }
 0x402   : > { %v251_v40 = vadd.f32 %v284_v38, %v250_v39  ;;  %v312_v41 = vpop.f32.mrb[5].mxu1 }
 0x403   : > { %v253_v42 = vpop.f32.mrb[6].mxu1 }
 0x404   : > { %258 = vst.msk [vmem:[%s256_s26] sm:$0x3] %vm257_vm3, %v251_v40  ;;  %v313_v43 = vpop.f32.mrb[7].mxu1 }

// kernel: stgat_forward.11
= control target key start
LH: loop header
LB: loop body
LE: loop exit
PB: predicated region body
PF: predicated region fallthrough
CT: control target
= control target key end

     0   :  { %v380_v1 = vmov 0.0   ;;  %vm381_vm0 = vmmov 0   ;;  %s482_s0 = inlined_call_operand.vmem [shape: f32[2,32], index: 0, kind: input, shape index: {}]   ;;  %s483_s1 = inlined_call_operand.vmem [shape: bf16[32,16], index: 1, kind: input, shape index: {}]   ;;  %s484_s2 = inlined_call_operand.vmem [shape: f32[1,16], index: 2, kind: input, shape index: {}]   ;;  %s485_s3 = inlined_call_operand.vmem [shape: bf16[16,16], index: 3, kind: input, shape index: {}]   ;;  %s486_s4 = inlined_call_operand.vmem [shape: f32[1,16], index: 4, kind: input, shape index: {}]   ;;  %s487_s5 = inlined_call_operand.vmem [shape: bf16[16,16], index: 5, kind: input, shape index: {}]   ;;  %s488_s6 = inlined_call_operand.vmem [shape: f32[1,16], index: 6, kind: input, shape index: {}]   ;;  %s489_s7 = inlined_call_operand.vmem [shape: bf16[16,4], index: 7, kind: input, shape index: {}]   ;;  %s490_s8 = inlined_call_operand.vmem [shape: f32[1,4], index: 8, kind: input, shape index: {}]   ;;  %s491_s9 = inlined_call_operand.hbm [shape: f32[2,4], index: 9, kind: output, shape index: {}]  }
   0x1   :  { %v351_v0 = vld [vmem:[%s483_s1] sm:$0xff]   ;;  %322 = vmatprep.subr.bf16.mxu0 %v380_v1  ;;  %330 = vmatprep.subr.bf16.mxu1 %v380_v1  ;;  %v352_v2 = vld [vmem:[%s483_s1 + $0x8] sm:$0xff]  }
   0x2   :  { %323 = vmatpush3.bf16.msra.mxu0 %v351_v0  ;;  %326 = vmatprep.mubr.msk.bf16.mxu0 %vm381_vm0, %v380_v1  ;;  %v34_v3 = vld [vmem:[%s482_s0] sm:$0x3] }
   0x3   :  { %324 = vmatprep.subr.bf16.mxu0 %v380_v1  ;;  %332 = vmatprep.mubr.msk.bf16.mxu1 %vm381_vm0, %v380_v1  ;;  %v40_v4 = vpack.c.bf16 %v34_v3, %v34_v3 }
   0x4   :  { %14 = vsyncpa [#allocation3], 0  ;;  %vm59_vm1 = vcmask 261120   ;;  %v353_v5 = vld [vmem:[%s485_s3] sm:$0xff]   ;;  %vm120_vm2 = vcmask 130048   ;;  %s382_s22 = smov [#allocation2]  }
   0x5   :  { %331 = vmatpush3.bf16.msra.mxu1 %v353_v5  ;;  %v300_v6 = vld [vmem:[%s484_s2] ss:$0 sm:$0xff]  ;;  %s292_s23 = sshll.u32 %s382_s22, 4  ;;  %vm284_vm3 = vcmask 25600   ;;  %s293_s23 = int_to_ptr.vmem [resolvable:$true] %s292_s23 }
   0x6   :  { %325 = vmatpush3.bf16.msra.mxu0 %v352_v2  ;;  %336 = vmatprep.subr.bf16.mxu1 %v380_v1  ;;  %v354_v13 = vld [vmem:[%s487_s5] sm:$0xff]   ;;  %p361_p1 = scmp.lt.s32.totalorder %s293_s23, %s293_s23 }
   0x7   :  { %342 = vmatprep.subr.bf16.mxu0 %v380_v1  ;;  %v355_v15 = vld [vmem:[%s489_s7] sm:$0xff]  }
   0x8   :  { %v304_v16 = vld [vmem:[%s486_s4] ss:$0 sm:$0xff] }
   0x9   :  { %327 = vmatmul.mubr.msk.bf16.vlgmr.msra.gmra.mrb[0].mxu0 %vm59_vm1, %v40_v4  ;;  %v307_v24 = vld [vmem:[%s488_s6] ss:$0 sm:$0xff]  ;;  %s356_s6 = scalar_lea.vmem %s293_s23, 32 }
   0xa   :  { %344 = vmatprep.mubr.msk.bf16.mxu0 %vm381_vm0, %v380_v1  ;;  %343 = vmatpush3.bf16.msra.mxu0 %v355_v15  ;;  %v310_v32 = vld [vmem:[%s490_s8] ss:$0 sm:$0xff]  ;;  %p357_p0 = scmp.ne.s32.totalorder %s293_s23, %s356_s6  ;;  %p362_p2 = scmp.lt.s32.totalorder %s356_s6, %s356_s6 }
   0xc   :  { %p363_p3 = por %p362_p2, %p361_p1 }
   0xe   :  { %p364_p4 = pnand %p363_p3, %p357_p0 }
  0xdc   :  { %v97_v7 = vpop.f32.mrb[0].mxu0 }
  0xdd   :  { %v98_v8 = vadd.f32 %v300_v6, %v97_v7  ;;  %v328_v9 = vpop.f32.mrb[1].mxu0 }
  0xde   :  { %v100_v10 = vpop.f32.mrb[2].mxu0 }
  0xdf   :  { %v103_v11 = vmax.f32 %v98_v8, 0.0  ;;  %v329_v12 = vpop.f32.mrb[3].mxu0 }
  0xe1   :  { %v107_v14 = vpack.c.bf16 %v103_v11, %v103_v11 }
  0xe3   :  { %333 = vmatmul.mubr.msk.bf16.vlgmr.msra.gmra.mrb[0].mxu1 %vm120_vm2, %v107_v14 }
  0xe4   :  { %337 = vmatpush3.bf16.msra.mxu1 %v354_v13  ;;  %338 = vmatprep.mubr.msk.bf16.mxu1 %vm381_vm0, %v380_v1 }
 0x1b6   :  { %v158_v17 = vpop.f32.mrb[0].mxu1 }
 0x1b7   :  { %v159_v18 = vadd.f32 %v304_v16, %v158_v17  ;;  %v334_v19 = vpop.f32.mrb[1].mxu1 }
 0x1b8   :  { %v161_v20 = vpop.f32.mrb[2].mxu1 }
 0x1b9   :  { %v164_v21 = vmax.f32 %v159_v18, 0.0  ;;  %v335_v22 = vpop.f32.mrb[3].mxu1 }
 0x1bb   :  { %v168_v23 = vpack.c.bf16 %v164_v21, %v164_v21 }
 0x1bd   :  { %339 = vmatmul.mubr.msk.bf16.vlgmr.msra.gmra.mrb[4].mxu1 %vm120_vm2, %v168_v23 }
 0x290   :  { %v218_v25 = vpop.f32.mrb[4].mxu1 }
 0x291   :  { %v219_v26 = vadd.f32 %v307_v24, %v218_v25  ;;  %v340_v27 = vpop.f32.mrb[5].mxu1 }
 0x292   :  { %v221_v28 = vpop.f32.mrb[6].mxu1 }
 0x293   :  { %v224_v29 = vmax.f32 %v219_v26, 0.0  ;;  %v341_v30 = vpop.f32.mrb[7].mxu1 }
 0x295   :  { %v228_v31 = vpack.c.bf16 %v224_v29, %v224_v29 }
 0x297   :  { %345 = vmatmul.mubr.msk.bf16.vlgmr.msra.gmra.mrb[4].mxu0 %vm120_vm2, %v228_v31 }
 0x36a   :  { %v278_v33 = vpop.f32.mrb[4].mxu0 }
 0x36b   :  { %v279_v34 = vadd.f32 %v310_v32, %v278_v33  ;;  %v346_v35 = vpop.f32.mrb[5].mxu0 }
 0x36c   :  { %v281_v36 = vpop.f32.mrb[6].mxu0 }
 0x36d   :  { %v347_v37 = vpop.f32.mrb[7].mxu0  ;;  %285 = vst.msk [vmem:[#allocation2] sm:$0x3] %vm284_vm3, %v279_v34 }
 0x36e   :  { %367 = shalt.err (!%p364_p4)
}
 0x36f   :  { %s368_s8 = scalar_lea.hbm %s491_s9, 32 }
 0x370   :  { %p369_p5 = scmp.ne.s32.totalorder %s491_s9, %s368_s8  ;;  %p372_p6 = scmp.lt.u32.totalorder %s368_s8, %s491_s9 }
 0x372   :  { %p374_p7 = pnand %p372_p6, %p369_p5 }
 0x374   :  { %377 = shalt.err (!%p374_p7)
}
 0x375   :  { %295 = dma.vmem_to_hbm [thread:$0]  %s293_s23, 32, %s491_s9, [#allocation3]  }
 0x376   :  { %378 = dma.done.wait [#allocation3], 32  }
 0x377   :  { %379 = vsyncadd [#allocation3], 4294967264 }
 0x378   :  { %299 = vsyncpa [#allocation3], 1 }

</bundles_post_ra>
